<compile_context>
chip_gen: v7x
topology: tpu7x:2x2x1
jax: 0.10.0
libtpu: 0.0.40
codegen_flags: <defaults>
</compile_context>

<pallas_src>
import functools
import math

import jax
import jax.numpy as jnp
from jax.experimental import pallas as pl
from jax.experimental.pallas import tpu as pltpu


# ---------------------------------------------------------------------------
# Kernel
# ---------------------------------------------------------------------------
def _kan_layer_compute(x, w, *, spline_order, inv_h_orders, knot_vals, compute_dtype):
    """One KAN layer on in-register activations.

    x : (TB, I) f32 activations
    w : ((K+1)*I, O[_padded]) compute_dtype
        row t*I + i = scale_spline * spline_weight[o, i, t]   (t = 0..K-1)
        row K*I + i = base_weight[o, i]
    """
    G = len(knot_vals)                                   # number of knots
    # base branch: SiLU(x)  (EUP exp + VPU mul)
    silu_x = x * (1.0 / (1.0 + jnp.exp(-x)))

    # Uniform grid: every knot is a compile-time scalar constant, so we only need
    # the shifted copies d[t] = x - knot_t (no knots tensor, no x replication).
    d = [x - knot_vals[t] for t in range(G)]

    # order-0 bases: indicator of [knot_t, knot_{t+1})  (strict '<' matches PyTorch)
    bases = [jnp.logical_and(d[t] >= 0.0, d[t + 1] < 0.0).astype(jnp.float32)
             for t in range(G - 1)]

    # Cox-de Boor recursion; uniform grid => denominators are the constants k*h,
    # numerators are d[t] and -(d[t+k+1]).  Pure VALU mul/add on (TB, I) blocks.
    for k in range(1, spline_order + 1):
        inv_kh = inv_h_orders[k - 1]
        bases = [inv_kh * (d[t] * bases[t] - d[t + k + 1] * bases[t + 1])
                 for t in range(G - 1 - k)]
    # bases: K = grid_size + spline_order blocks of (TB, I)

    # Fused feature slab [bases | silu], built directly in bf16 so the concat moves
    # half the bytes and the base block starts at K*I lanes (128-aligned here).
    feats = jnp.concatenate(
        [b.astype(compute_dtype) for b in bases] + [silu_x.astype(compute_dtype)],
        axis=1)                                          # (TB, (K+1)*I)

    # Single MXU pass: base + spline contraction together.
    return jnp.dot(feats, w, preferred_element_type=jnp.float32)   # (TB, O) f32


def fused_kan_kernel(*refs, spline_order, inv_h_orders, knot_vals, compute_dtype):
    """refs = (x_ref, w_0, w_1, ..., out_ref)."""
    x_ref = refs[0]
    out_ref = refs[-1]
    w_refs = refs[1:-1]

    act = x_ref[...].astype(jnp.float32)
    for w_ref in w_refs:
        act = _kan_layer_compute(act, w_ref[...],
                                 spline_order=spline_order,
                                 inv_h_orders=inv_h_orders,
                                 knot_vals=knot_vals,
                                 compute_dtype=compute_dtype)
    out_ref[...] = act.astype(out_ref.dtype)


# ---------------------------------------------------------------------------
# Wrapper / parameters
# ---------------------------------------------------------------------------
class KANPallas:
    """JAX/Pallas equivalent of the PyTorch KAN module's forward pass."""

    def __init__(self, layers, key, grid_size=5, spline_order=3,
                 scale_noise=0.1, scale_base=1.0, scale_spline=1.0,
                 grid_eps=0.02, grid_range=(-1.0, 1.0),
                 compute_dtype=jnp.bfloat16):
        self.grid_size = grid_size
        self.spline_order = spline_order
        self.h = (grid_range[1] - grid_range[0]) / grid_size
        self.compute_dtype = compute_dtype
        self.dims = tuple(zip(layers[:-1], layers[1:]))        # ((I0,O0), (I1,O1), ...)

        G = grid_size + 2 * spline_order + 1                   # knots
        K = grid_size + spline_order                           # basis functions
        self.G, self.K = G, K
        grid_1d = (jnp.arange(-spline_order, grid_size + spline_order + 1,
                              dtype=jnp.float32) * self.h + grid_range[0])  # (G,)
        self.grid_1d = grid_1d
        self.knot_vals = tuple(float(v) for v in grid_1d)      # compile-time scalars
        self.inv_h_orders = tuple(1.0 / (k * self.h) for k in range(1, spline_order + 1))

        O_last = self.dims[-1][1]
        self.O_pad = ((O_last + 127) // 128) * 128             # lane-dense final store

        self.flat_params = []   # kernel inputs: one fused weight per layer
        self.ref_params = []    # f32 originals for the pure-JAX reference
        for li, (in_f, out_f) in enumerate(self.dims):
            key, k1, k2 = jax.random.split(key, 3)
            # base_weight ~ kaiming-style init (deterministic, synthetic)
            bound = scale_base * math.sqrt(3.0 / in_f)
            base_w = jax.random.uniform(k1, (out_f, in_f), jnp.float32,
                                        minval=-bound, maxval=bound)
            # spline_weight: small noise init (mimics curve2coeff of scaled noise)
            spline_w = scale_spline * (scale_noise / grid_size) * \
                jax.random.normal(k2, (out_f, in_f, K), jnp.float32)

            # Fused weight, spline rows first (matches the kernel's [bases | silu] order):
            #   row t*in_f + i = spline_w[o, i, t] ;  row K*in_f + i = base_w[o, i]
            spline_flat = jnp.transpose(spline_w, (2, 1, 0)).reshape(K * in_f, out_f)
            w_full = jnp.concatenate([spline_flat, jnp.transpose(base_w)], axis=0)
            if li == len(self.dims) - 1 and self.O_pad != out_f:
                w_full = jnp.pad(w_full, ((0, 0), (0, self.O_pad - out_f)))
            self.flat_params.append(w_full.astype(compute_dtype))
            self.ref_params.append((base_w, spline_w))

    # ----- batch-tile selection against a portable VMEM budget -----
    def _pick_batch_tile(self, B):
        if B <= 512:
            return max(8, ((B + 7) // 8) * 8)                  # single block
        # per-row working-set estimate (bytes), max over layers
        per_row = 0
        for li, (in_f, out_f) in enumerate(self.dims):
            o = self.O_pad if li == len(self.dims) - 1 else out_f
            per_row = max(per_row,
                          4 * in_f * (2 * self.G)              # x, d[t], bases[t] (f32)
                          + 2 * in_f * (self.K + 1)            # bf16 feats slab
                          + 4 * o)                             # f32 layer output
        per_row += 8 * (self.dims[0][0] + self.O_pad)          # double-buffered x/out DMA
        budget = 12 << 20          # headroom inside the 32 MiB scoped-VMEM request
        tb = 2048
        while tb > 256 and tb * per_row > budget:
            tb //= 2
        # keep at least 2 grid steps so v7x's second TensorCore gets work
        while tb > 256 and -(-B // tb) < 2:
            tb //= 2
        return tb

    # ----- Pallas forward -----
    def __call__(self, x, update_grid=False):
        # TODO(synk): update_grid (adaptive knot refit via lstsq) is a training-time
        # procedure and is not implemented; only the forward pass is.
        B, I0 = x.shape
        assert I0 == self.dims[0][0]
        O_last = self.dims[-1][1]
        O_pad = self.O_pad
        K = self.K

        TB = self._pick_batch_tile(B)
        B_pad = ((B + TB - 1) // TB) * TB
        if B_pad != B:
            x = jnp.pad(x, ((0, B_pad - B), (0, 0)))

        in_specs = [pl.BlockSpec((TB, I0), lambda b: (b, 0))]
        for w in self.flat_params:                             # full weight, VMEM-resident
            in_specs.append(pl.BlockSpec(w.shape, lambda b: (0, 0)))
        out_specs = pl.BlockSpec((TB, O_pad), lambda b: (b, 0))

        # Advisory cost estimate for the XLA scheduler.
        flops = 0
        transcendentals = 0
        for in_f, out_f in self.dims:
            flops += 2 * B_pad * in_f * (K + 1) * out_f        # MXU
            flops += B_pad * in_f * (2 * self.G + 10 * K)      # spline recursion (rough)
            transcendentals += B_pad * in_f                    # SiLU exp
        bytes_accessed = 4 * B_pad * (I0 + O_pad) + \
            sum(int(w.size) * w.dtype.itemsize for w in self.flat_params)
        cost = pl.CostEstimate(flops=int(flops),
                               transcendentals=int(transcendentals),
                               bytes_accessed=int(bytes_accessed))

        kernel = functools.partial(
            fused_kan_kernel,
            spline_order=self.spline_order,
            inv_h_orders=self.inv_h_orders,
            knot_vals=self.knot_vals,
            compute_dtype=self.compute_dtype)

        y = pl.pallas_call(
            kernel,
            grid=(B_pad // TB,),
            in_specs=in_specs,
            out_specs=out_specs,
            out_shape=jax.ShapeDtypeStruct((B_pad, O_pad), jnp.float32),
            compiler_params=pltpu.CompilerParams(
                dimension_semantics=("parallel",),
                vmem_limit_bytes=32 * 1024 * 1024),
            cost_estimate=cost,
        )(x, *self.flat_params)
        return y[:B, :O_last]

    # ----- pure-JAX f32 reference (efficient-KAN math, for validation) -----
    def reference_forward(self, x):
        g1 = self.grid_1d
        for (in_f, _out_f), (base_w, spline_w) in zip(self.dims, self.ref_params):
            g = jnp.broadcast_to(g1[None, :], (in_f, g1.shape[0]))          # (I, G)
            xg = x[:, :, None]
            bases = ((xg >= g[None, :, :-1]) & (xg < g[None, :, 1:])).astype(jnp.float32)
            for k in range(1, self.spline_order + 1):
                bases = ((xg - g[None, :, :-(k + 1)]) /
                         (g[None, :, k:-1] - g[None, :, :-(k + 1)]) * bases[..., :-1]
                         + (g[None, :, k + 1:] - xg) /
                         (g[None, :, k + 1:] - g[None, :, 1:-k]) * bases[..., 1:])
            silu = x * jax.nn.sigmoid(x)
            base_out = silu @ base_w.T
            spline_out = bases.reshape(x.shape[0], -1) @ \
                spline_w.reshape(spline_w.shape[0], -1).T
            x = base_out + spline_out
        return x


# ---------------------------------------------------------------------------
if __name__ == "__main__":
    key = jax.random.PRNGKey(0)
    key, kx, kp = jax.random.split(key, 3)

    batch = 8
    layers = [16, 32, 8]          # in_features -> hidden -> out_features

    # Inputs roughly within grid_range [-1, 1]
    x = jax.random.uniform(kx, (batch, layers[0]), jnp.float32,
                           minval=-0.9, maxval=0.9)

    model = KANPallas(layers, key=kp, grid_size=5, spline_order=3)

    y = jax.block_until_ready(model(x))
    assert y.shape == (batch, layers[-1]) and y.dtype == jnp.float32
    assert bool(jnp.all(jnp.isfinite(y)))

    # Validate against the pure-JAX f32 reference (bf16 matmuls => loose tolerance).
    y_ref = model.reference_forward(x)
    max_err = float(jnp.max(jnp.abs(y - y_ref)))
    assert max_err < 5e-2, f"max abs err vs reference: {max_err}"

    # Exercise the multi-tile (grid > 1) pipelined path incl. batch padding.
    key, kx2 = jax.random.split(key)
    xb = jax.random.uniform(kx2, (1030, layers[0]), jnp.float32,
                            minval=-0.9, maxval=0.9)
    yb = jax.block_until_ready(model(xb))
    assert yb.shape == (1030, layers[-1])
    assert bool(jnp.all(jnp.isfinite(yb)))
    yb_ref = model.reference_forward(xb)
    max_err_b = float(jnp.max(jnp.abs(yb - yb_ref)))
    assert max_err_b < 1.5e-1, f"max abs err (large batch) vs reference: {max_err_b}"

    print("KERNEL_OK")
</pallas_src>

<mosaic_0001>
module attributes {stable_mosaic.version = 11 : i64} {
  func.func @fused_kan_kernel(%arg0: i32, %arg1: memref<8x16xf32, #tpu.memory_space<vmem>>, %arg2: memref<144x32xbf16, #tpu.memory_space<vmem>>, %arg3: memref<288x128xbf16, #tpu.memory_space<vmem>>, %arg4: memref<8x128xf32, #tpu.memory_space<vmem>>) attributes {dimension_semantics = [#tpu.dimension_semantics<parallel>], iteration_bounds = array<i64: 1>, scalar_prefetch = 0 : i64, scratch_operands = 0 : i64, tpu.core_type = #tpu.core_type<tc>, window_params = [{transform_indices = @transform_0, window_bounds = array<i64: 8, 16>}, {pipeline_mode = #tpu.pipeline_mode<synchronous>, transform_indices = @transform_1, window_bounds = array<i64: 144, 32>}, {pipeline_mode = #tpu.pipeline_mode<synchronous>, transform_indices = @transform_2, window_bounds = array<i64: 288, 128>}, {transform_indices = @transform_3, window_bounds = array<i64: 8, 128>}]} {
    %c0 = arith.constant 0 : index
    %c0_0 = arith.constant 0 : index
    %0 = vector.load %arg1[%c0, %c0_0] : memref<8x16xf32, #tpu.memory_space<vmem>>, vector<8x16xf32>
    %c0_1 = arith.constant 0 : index
    %c0_2 = arith.constant 0 : index
    %1 = vector.load %arg2[%c0_1, %c0_2] : memref<144x32xbf16, #tpu.memory_space<vmem>>, vector<144x32xbf16>
    %cst = arith.constant 0.000000e+00 : f32
    %2 = vector.broadcast %cst : f32 to vector<8x16xf32>
    %3 = arith.subf %2, %0 : vector<8x16xf32>
    %4 = math.exp %3 : vector<8x16xf32>
    %cst_3 = arith.constant 1.000000e+00 : f32
    %5 = vector.broadcast %cst_3 : f32 to vector<8x16xf32>
    %6 = arith.addf %5, %4 : vector<8x16xf32>
    %cst_4 = arith.constant 1.000000e+00 : f32
    %7 = vector.broadcast %cst_4 : f32 to vector<8x16xf32>
    %8 = arith.divf %7, %6 : vector<8x16xf32>
    %9 = arith.mulf %0, %8 : vector<8x16xf32>
    %cst_5 = arith.constant -2.200000e+00 : f32
    %10 = vector.broadcast %cst_5 : f32 to vector<8x16xf32>
    %11 = arith.subf %0, %10 : vector<8x16xf32>
    %cst_6 = arith.constant -1.800000e+00 : f32
    %12 = vector.broadcast %cst_6 : f32 to vector<8x16xf32>
    %13 = arith.subf %0, %12 : vector<8x16xf32>
    %cst_7 = arith.constant -1.400000e+00 : f32
    %14 = vector.broadcast %cst_7 : f32 to vector<8x16xf32>
    %15 = arith.subf %0, %14 : vector<8x16xf32>
    %cst_8 = arith.constant -1.000000e+00 : f32
    %16 = vector.broadcast %cst_8 : f32 to vector<8x16xf32>
    %17 = arith.subf %0, %16 : vector<8x16xf32>
    %cst_9 = arith.constant -6.000000e-01 : f32
    %18 = vector.broadcast %cst_9 : f32 to vector<8x16xf32>
    %19 = arith.subf %0, %18 : vector<8x16xf32>
    %cst_10 = arith.constant -0.199999988 : f32
    %20 = vector.broadcast %cst_10 : f32 to vector<8x16xf32>
    %21 = arith.subf %0, %20 : vector<8x16xf32>
    %cst_11 = arith.constant 0.200000048 : f32
    %22 = vector.broadcast %cst_11 : f32 to vector<8x16xf32>
    %23 = arith.subf %0, %22 : vector<8x16xf32>
    %cst_12 = arith.constant 6.000000e-01 : f32
    %24 = vector.broadcast %cst_12 : f32 to vector<8x16xf32>
    %25 = arith.subf %0, %24 : vector<8x16xf32>
    %cst_13 = arith.constant 1.000000e+00 : f32
    %26 = vector.broadcast %cst_13 : f32 to vector<8x16xf32>
    %27 = arith.subf %0, %26 : vector<8x16xf32>
    %cst_14 = arith.constant 1.4000001 : f32
    %28 = vector.broadcast %cst_14 : f32 to vector<8x16xf32>
    %29 = arith.subf %0, %28 : vector<8x16xf32>
    %cst_15 = arith.constant 1.800000e+00 : f32
    %30 = vector.broadcast %cst_15 : f32 to vector<8x16xf32>
    %31 = arith.subf %0, %30 : vector<8x16xf32>
    %cst_16 = arith.constant 2.200000e+00 : f32
    %32 = vector.broadcast %cst_16 : f32 to vector<8x16xf32>
    %33 = arith.subf %0, %32 : vector<8x16xf32>
    %cst_17 = arith.constant 0.000000e+00 : f32
    %34 = vector.broadcast %cst_17 : f32 to vector<8x16xf32>
    %35 = arith.cmpf oge, %11, %34 : vector<8x16xf32>
    %cst_18 = arith.constant 0.000000e+00 : f32
    %36 = vector.broadcast %cst_18 : f32 to vector<8x16xf32>
    %37 = arith.cmpf olt, %13, %36 : vector<8x16xf32>
    %38 = arith.andi %35, %37 : vector<8x16xi1>
    %39 = arith.extui %38 : vector<8x16xi1> to vector<8x16xi32>
    %40 = arith.sitofp %39 : vector<8x16xi32> to vector<8x16xf32>
    %cst_19 = arith.constant 0.000000e+00 : f32
    %41 = vector.broadcast %cst_19 : f32 to vector<8x16xf32>
    %42 = arith.cmpf oge, %13, %41 : vector<8x16xf32>
    %cst_20 = arith.constant 0.000000e+00 : f32
    %43 = vector.broadcast %cst_20 : f32 to vector<8x16xf32>
    %44 = arith.cmpf olt, %15, %43 : vector<8x16xf32>
    %45 = arith.andi %42, %44 : vector<8x16xi1>
    %46 = arith.extui %45 : vector<8x16xi1> to vector<8x16xi32>
    %47 = arith.sitofp %46 : vector<8x16xi32> to vector<8x16xf32>
    %cst_21 = arith.constant 0.000000e+00 : f32
    %48 = vector.broadcast %cst_21 : f32 to vector<8x16xf32>
    %49 = arith.cmpf oge, %15, %48 : vector<8x16xf32>
    %cst_22 = arith.constant 0.000000e+00 : f32
    %50 = vector.broadcast %cst_22 : f32 to vector<8x16xf32>
    %51 = arith.cmpf olt, %17, %50 : vector<8x16xf32>
    %52 = arith.andi %49, %51 : vector<8x16xi1>
    %53 = arith.extui %52 : vector<8x16xi1> to vector<8x16xi32>
    %54 = arith.sitofp %53 : vector<8x16xi32> to vector<8x16xf32>
    %cst_23 = arith.constant 0.000000e+00 : f32
    %55 = vector.broadcast %cst_23 : f32 to vector<8x16xf32>
    %56 = arith.cmpf oge, %17, %55 : vector<8x16xf32>
    %cst_24 = arith.constant 0.000000e+00 : f32
    %57 = vector.broadcast %cst_24 : f32 to vector<8x16xf32>
    %58 = arith.cmpf olt, %19, %57 : vector<8x16xf32>
    %59 = arith.andi %56, %58 : vector<8x16xi1>
    %60 = arith.extui %59 : vector<8x16xi1> to vector<8x16xi32>
    %61 = arith.sitofp %60 : vector<8x16xi32> to vector<8x16xf32>
    %cst_25 = arith.constant 0.000000e+00 : f32
    %62 = vector.broadcast %cst_25 : f32 to vector<8x16xf32>
    %63 = arith.cmpf oge, %19, %62 : vector<8x16xf32>
    %cst_26 = arith.constant 0.000000e+00 : f32
    %64 = vector.broadcast %cst_26 : f32 to vector<8x16xf32>
    %65 = arith.cmpf olt, %21, %64 : vector<8x16xf32>
    %66 = arith.andi %63, %65 : vector<8x16xi1>
    %67 = arith.extui %66 : vector<8x16xi1> to vector<8x16xi32>
    %68 = arith.sitofp %67 : vector<8x16xi32> to vector<8x16xf32>
    %cst_27 = arith.constant 0.000000e+00 : f32
    %69 = vector.broadcast %cst_27 : f32 to vector<8x16xf32>
    %70 = arith.cmpf oge, %21, %69 : vector<8x16xf32>
    %cst_28 = arith.constant 0.000000e+00 : f32
    %71 = vector.broadcast %cst_28 : f32 to vector<8x16xf32>
    %72 = arith.cmpf olt, %23, %71 : vector<8x16xf32>
    %73 = arith.andi %70, %72 : vector<8x16xi1>
    %74 = arith.extui %73 : vector<8x16xi1> to vector<8x16xi32>
    %75 = arith.sitofp %74 : vector<8x16xi32> to vector<8x16xf32>
    %cst_29 = arith.constant 0.000000e+00 : f32
    %76 = vector.broadcast %cst_29 : f32 to vector<8x16xf32>
    %77 = arith.cmpf oge, %23, %76 : vector<8x16xf32>
    %cst_30 = arith.constant 0.000000e+00 : f32
    %78 = vector.broadcast %cst_30 : f32 to vector<8x16xf32>
    %79 = arith.cmpf olt, %25, %78 : vector<8x16xf32>
    %80 = arith.andi %77, %79 : vector<8x16xi1>
    %81 = arith.extui %80 : vector<8x16xi1> to vector<8x16xi32>
    %82 = arith.sitofp %81 : vector<8x16xi32> to vector<8x16xf32>
    %cst_31 = arith.constant 0.000000e+00 : f32
    %83 = vector.broadcast %cst_31 : f32 to vector<8x16xf32>
    %84 = arith.cmpf oge, %25, %83 : vector<8x16xf32>
    %cst_32 = arith.constant 0.000000e+00 : f32
    %85 = vector.broadcast %cst_32 : f32 to vector<8x16xf32>
    %86 = arith.cmpf olt, %27, %85 : vector<8x16xf32>
    %87 = arith.andi %84, %86 : vector<8x16xi1>
    %88 = arith.extui %87 : vector<8x16xi1> to vector<8x16xi32>
    %89 = arith.sitofp %88 : vector<8x16xi32> to vector<8x16xf32>
    %cst_33 = arith.constant 0.000000e+00 : f32
    %90 = vector.broadcast %cst_33 : f32 to vector<8x16xf32>
    %91 = arith.cmpf oge, %27, %90 : vector<8x16xf32>
    %cst_34 = arith.constant 0.000000e+00 : f32
    %92 = vector.broadcast %cst_34 : f32 to vector<8x16xf32>
    %93 = arith.cmpf olt, %29, %92 : vector<8x16xf32>
    %94 = arith.andi %91, %93 : vector<8x16xi1>
    %95 = arith.extui %94 : vector<8x16xi1> to vector<8x16xi32>
    %96 = arith.sitofp %95 : vector<8x16xi32> to vector<8x16xf32>
    %cst_35 = arith.constant 0.000000e+00 : f32
    %97 = vector.broadcast %cst_35 : f32 to vector<8x16xf32>
    %98 = arith.cmpf oge, %29, %97 : vector<8x16xf32>
    %cst_36 = arith.constant 0.000000e+00 : f32
    %99 = vector.broadcast %cst_36 : f32 to vector<8x16xf32>
    %100 = arith.cmpf olt, %31, %99 : vector<8x16xf32>
    %101 = arith.andi %98, %100 : vector<8x16xi1>
    %102 = arith.extui %101 : vector<8x16xi1> to vector<8x16xi32>
    %103 = arith.sitofp %102 : vector<8x16xi32> to vector<8x16xf32>
    %cst_37 = arith.constant 0.000000e+00 : f32
    %104 = vector.broadcast %cst_37 : f32 to vector<8x16xf32>
    %105 = arith.cmpf oge, %31, %104 : vector<8x16xf32>
    %cst_38 = arith.constant 0.000000e+00 : f32
    %106 = vector.broadcast %cst_38 : f32 to vector<8x16xf32>
    %107 = arith.cmpf olt, %33, %106 : vector<8x16xf32>
    %108 = arith.andi %105, %107 : vector<8x16xi1>
    %109 = arith.extui %108 : vector<8x16xi1> to vector<8x16xi32>
    %110 = arith.sitofp %109 : vector<8x16xi32> to vector<8x16xf32>
    %111 = arith.mulf %11, %40 : vector<8x16xf32>
    %112 = arith.mulf %15, %47 : vector<8x16xf32>
    %113 = arith.subf %111, %112 : vector<8x16xf32>
    %cst_39 = arith.constant 2.500000e+00 : f32
    %114 = vector.broadcast %cst_39 : f32 to vector<8x16xf32>
    %115 = arith.mulf %114, %113 : vector<8x16xf32>
    %116 = arith.mulf %13, %47 : vector<8x16xf32>
    %117 = arith.mulf %17, %54 : vector<8x16xf32>
    %118 = arith.subf %116, %117 : vector<8x16xf32>
    %cst_40 = arith.constant 2.500000e+00 : f32
    %119 = vector.broadcast %cst_40 : f32 to vector<8x16xf32>
    %120 = arith.mulf %119, %118 : vector<8x16xf32>
    %121 = arith.mulf %15, %54 : vector<8x16xf32>
    %122 = arith.mulf %19, %61 : vector<8x16xf32>
    %123 = arith.subf %121, %122 : vector<8x16xf32>
    %cst_41 = arith.constant 2.500000e+00 : f32
    %124 = vector.broadcast %cst_41 : f32 to vector<8x16xf32>
    %125 = arith.mulf %124, %123 : vector<8x16xf32>
    %126 = arith.mulf %17, %61 : vector<8x16xf32>
    %127 = arith.mulf %21, %68 : vector<8x16xf32>
    %128 = arith.subf %126, %127 : vector<8x16xf32>
    %cst_42 = arith.constant 2.500000e+00 : f32
    %129 = vector.broadcast %cst_42 : f32 to vector<8x16xf32>
    %130 = arith.mulf %129, %128 : vector<8x16xf32>
    %131 = arith.mulf %19, %68 : vector<8x16xf32>
    %132 = arith.mulf %23, %75 : vector<8x16xf32>
    %133 = arith.subf %131, %132 : vector<8x16xf32>
    %cst_43 = arith.constant 2.500000e+00 : f32
    %134 = vector.broadcast %cst_43 : f32 to vector<8x16xf32>
    %135 = arith.mulf %134, %133 : vector<8x16xf32>
    %136 = arith.mulf %21, %75 : vector<8x16xf32>
    %137 = arith.mulf %25, %82 : vector<8x16xf32>
    %138 = arith.subf %136, %137 : vector<8x16xf32>
    %cst_44 = arith.constant 2.500000e+00 : f32
    %139 = vector.broadcast %cst_44 : f32 to vector<8x16xf32>
    %140 = arith.mulf %139, %138 : vector<8x16xf32>
    %141 = arith.mulf %23, %82 : vector<8x16xf32>
    %142 = arith.mulf %27, %89 : vector<8x16xf32>
    %143 = arith.subf %141, %142 : vector<8x16xf32>
    %cst_45 = arith.constant 2.500000e+00 : f32
    %144 = vector.broadcast %cst_45 : f32 to vector<8x16xf32>
    %145 = arith.mulf %144, %143 : vector<8x16xf32>
    %146 = arith.mulf %25, %89 : vector<8x16xf32>
    %147 = arith.mulf %29, %96 : vector<8x16xf32>
    %148 = arith.subf %146, %147 : vector<8x16xf32>
    %cst_46 = arith.constant 2.500000e+00 : f32
    %149 = vector.broadcast %cst_46 : f32 to vector<8x16xf32>
    %150 = arith.mulf %149, %148 : vector<8x16xf32>
    %151 = arith.mulf %27, %96 : vector<8x16xf32>
    %152 = arith.mulf %31, %103 : vector<8x16xf32>
    %153 = arith.subf %151, %152 : vector<8x16xf32>
    %cst_47 = arith.constant 2.500000e+00 : f32
    %154 = vector.broadcast %cst_47 : f32 to vector<8x16xf32>
    %155 = arith.mulf %154, %153 : vector<8x16xf32>
    %156 = arith.mulf %29, %103 : vector<8x16xf32>
    %157 = arith.mulf %33, %110 : vector<8x16xf32>
    %158 = arith.subf %156, %157 : vector<8x16xf32>
    %cst_48 = arith.constant 2.500000e+00 : f32
    %159 = vector.broadcast %cst_48 : f32 to vector<8x16xf32>
    %160 = arith.mulf %159, %158 : vector<8x16xf32>
    %161 = arith.mulf %11, %115 : vector<8x16xf32>
    %162 = arith.mulf %17, %120 : vector<8x16xf32>
    %163 = arith.subf %161, %162 : vector<8x16xf32>
    %cst_49 = arith.constant 1.250000e+00 : f32
    %164 = vector.broadcast %cst_49 : f32 to vector<8x16xf32>
    %165 = arith.mulf %164, %163 : vector<8x16xf32>
    %166 = arith.mulf %13, %120 : vector<8x16xf32>
    %167 = arith.mulf %19, %125 : vector<8x16xf32>
    %168 = arith.subf %166, %167 : vector<8x16xf32>
    %cst_50 = arith.constant 1.250000e+00 : f32
    %169 = vector.broadcast %cst_50 : f32 to vector<8x16xf32>
    %170 = arith.mulf %169, %168 : vector<8x16xf32>
    %171 = arith.mulf %15, %125 : vector<8x16xf32>
    %172 = arith.mulf %21, %130 : vector<8x16xf32>
    %173 = arith.subf %171, %172 : vector<8x16xf32>
    %cst_51 = arith.constant 1.250000e+00 : f32
    %174 = vector.broadcast %cst_51 : f32 to vector<8x16xf32>
    %175 = arith.mulf %174, %173 : vector<8x16xf32>
    %176 = arith.mulf %17, %130 : vector<8x16xf32>
    %177 = arith.mulf %23, %135 : vector<8x16xf32>
    %178 = arith.subf %176, %177 : vector<8x16xf32>
    %cst_52 = arith.constant 1.250000e+00 : f32
    %179 = vector.broadcast %cst_52 : f32 to vector<8x16xf32>
    %180 = arith.mulf %179, %178 : vector<8x16xf32>
    %181 = arith.mulf %19, %135 : vector<8x16xf32>
    %182 = arith.mulf %25, %140 : vector<8x16xf32>
    %183 = arith.subf %181, %182 : vector<8x16xf32>
    %cst_53 = arith.constant 1.250000e+00 : f32
    %184 = vector.broadcast %cst_53 : f32 to vector<8x16xf32>
    %185 = arith.mulf %184, %183 : vector<8x16xf32>
    %186 = arith.mulf %21, %140 : vector<8x16xf32>
    %187 = arith.mulf %27, %145 : vector<8x16xf32>
    %188 = arith.subf %186, %187 : vector<8x16xf32>
    %cst_54 = arith.constant 1.250000e+00 : f32
    %189 = vector.broadcast %cst_54 : f32 to vector<8x16xf32>
    %190 = arith.mulf %189, %188 : vector<8x16xf32>
    %191 = arith.mulf %23, %145 : vector<8x16xf32>
    %192 = arith.mulf %29, %150 : vector<8x16xf32>
    %193 = arith.subf %191, %192 : vector<8x16xf32>
    %cst_55 = arith.constant 1.250000e+00 : f32
    %194 = vector.broadcast %cst_55 : f32 to vector<8x16xf32>
    %195 = arith.mulf %194, %193 : vector<8x16xf32>
    %196 = arith.mulf %25, %150 : vector<8x16xf32>
    %197 = arith.mulf %31, %155 : vector<8x16xf32>
    %198 = arith.subf %196, %197 : vector<8x16xf32>
    %cst_56 = arith.constant 1.250000e+00 : f32
    %199 = vector.broadcast %cst_56 : f32 to vector<8x16xf32>
    %200 = arith.mulf %199, %198 : vector<8x16xf32>
    %201 = arith.mulf %27, %155 : vector<8x16xf32>
    %202 = arith.mulf %33, %160 : vector<8x16xf32>
    %203 = arith.subf %201, %202 : vector<8x16xf32>
    %cst_57 = arith.constant 1.250000e+00 : f32
    %204 = vector.broadcast %cst_57 : f32 to vector<8x16xf32>
    %205 = arith.mulf %204, %203 : vector<8x16xf32>
    %206 = arith.mulf %11, %165 : vector<8x16xf32>
    %207 = arith.mulf %19, %170 : vector<8x16xf32>
    %208 = arith.subf %206, %207 : vector<8x16xf32>
    %cst_58 = arith.constant 0.833333313 : f32
    %209 = vector.broadcast %cst_58 : f32 to vector<8x16xf32>
    %210 = arith.mulf %209, %208 : vector<8x16xf32>
    %211 = arith.mulf %13, %170 : vector<8x16xf32>
    %212 = arith.mulf %21, %175 : vector<8x16xf32>
    %213 = arith.subf %211, %212 : vector<8x16xf32>
    %cst_59 = arith.constant 0.833333313 : f32
    %214 = vector.broadcast %cst_59 : f32 to vector<8x16xf32>
    %215 = arith.mulf %214, %213 : vector<8x16xf32>
    %216 = arith.mulf %15, %175 : vector<8x16xf32>
    %217 = arith.mulf %23, %180 : vector<8x16xf32>
    %218 = arith.subf %216, %217 : vector<8x16xf32>
    %cst_60 = arith.constant 0.833333313 : f32
    %219 = vector.broadcast %cst_60 : f32 to vector<8x16xf32>
    %220 = arith.mulf %219, %218 : vector<8x16xf32>
    %221 = arith.mulf %17, %180 : vector<8x16xf32>
    %222 = arith.mulf %25, %185 : vector<8x16xf32>
    %223 = arith.subf %221, %222 : vector<8x16xf32>
    %cst_61 = arith.constant 0.833333313 : f32
    %224 = vector.broadcast %cst_61 : f32 to vector<8x16xf32>
    %225 = arith.mulf %224, %223 : vector<8x16xf32>
    %226 = arith.mulf %19, %185 : vector<8x16xf32>
    %227 = arith.mulf %27, %190 : vector<8x16xf32>
    %228 = arith.subf %226, %227 : vector<8x16xf32>
    %cst_62 = arith.constant 0.833333313 : f32
    %229 = vector.broadcast %cst_62 : f32 to vector<8x16xf32>
    %230 = arith.mulf %229, %228 : vector<8x16xf32>
    %231 = arith.mulf %21, %190 : vector<8x16xf32>
    %232 = arith.mulf %29, %195 : vector<8x16xf32>
    %233 = arith.subf %231, %232 : vector<8x16xf32>
    %cst_63 = arith.constant 0.833333313 : f32
    %234 = vector.broadcast %cst_63 : f32 to vector<8x16xf32>
    %235 = arith.mulf %234, %233 : vector<8x16xf32>
    %236 = arith.mulf %23, %195 : vector<8x16xf32>
    %237 = arith.mulf %31, %200 : vector<8x16xf32>
    %238 = arith.subf %236, %237 : vector<8x16xf32>
    %cst_64 = arith.constant 0.833333313 : f32
    %239 = vector.broadcast %cst_64 : f32 to vector<8x16xf32>
    %240 = arith.mulf %239, %238 : vector<8x16xf32>
    %241 = arith.mulf %25, %200 : vector<8x16xf32>
    %242 = arith.mulf %33, %205 : vector<8x16xf32>
    %243 = arith.subf %241, %242 : vector<8x16xf32>
    %cst_65 = arith.constant 0.833333313 : f32
    %244 = vector.broadcast %cst_65 : f32 to vector<8x16xf32>
    %245 = arith.mulf %244, %243 : vector<8x16xf32>
    %246 = arith.truncf %210 : vector<8x16xf32> to vector<8x16xbf16>
    %247 = arith.truncf %215 : vector<8x16xf32> to vector<8x16xbf16>
    %248 = arith.truncf %220 : vector<8x16xf32> to vector<8x16xbf16>
    %249 = arith.truncf %225 : vector<8x16xf32> to vector<8x16xbf16>
    %250 = arith.truncf %230 : vector<8x16xf32> to vector<8x16xbf16>
    %251 = arith.truncf %235 : vector<8x16xf32> to vector<8x16xbf16>
    %252 = arith.truncf %240 : vector<8x16xf32> to vector<8x16xbf16>
    %253 = arith.truncf %245 : vector<8x16xf32> to vector<8x16xbf16>
    %254 = arith.truncf %9 : vector<8x16xf32> to vector<8x16xbf16>
    %255 = tpu.concatenate %246, %247, %248, %249, %250, %251, %252, %253, %254 in 1 : vector<8x16xbf16>, vector<8x16xbf16>, vector<8x16xbf16>, vector<8x16xbf16>, vector<8x16xbf16>, vector<8x16xbf16>, vector<8x16xbf16>, vector<8x16xbf16>, vector<8x16xbf16> -> vector<8x144xbf16>
    %cst_66 = arith.constant dense<0.000000e+00> : vector<8x32xf32>
    %256 = tpu.matmul %255, %1, %cst_66 {dimension_numbers = #tpu.dot_dimension_numbers<[1], [0], [0], [1], [0, 0, 1, 1], [], []>} : vector<8x144xbf16>, vector<144x32xbf16>, vector<8x32xf32> -> vector<8x32xf32>
    %c0_67 = arith.constant 0 : index
    %c0_68 = arith.constant 0 : index
    %257 = vector.load %arg3[%c0_67, %c0_68] : memref<288x128xbf16, #tpu.memory_space<vmem>>, vector<288x128xbf16>
    %cst_69 = arith.constant 0.000000e+00 : f32
    %258 = vector.broadcast %cst_69 : f32 to vector<8x32xf32>
    %259 = arith.subf %258, %256 : vector<8x32xf32>
    %260 = math.exp %259 : vector<8x32xf32>
    %cst_70 = arith.constant 1.000000e+00 : f32
    %261 = vector.broadcast %cst_70 : f32 to vector<8x32xf32>
    %262 = arith.addf %261, %260 : vector<8x32xf32>
    %cst_71 = arith.constant 1.000000e+00 : f32
    %263 = vector.broadcast %cst_71 : f32 to vector<8x32xf32>
    %264 = arith.divf %263, %262 : vector<8x32xf32>
    %265 = arith.mulf %256, %264 : vector<8x32xf32>
    %cst_72 = arith.constant -2.200000e+00 : f32
    %266 = vector.broadcast %cst_72 : f32 to vector<8x32xf32>
    %267 = arith.subf %256, %266 : vector<8x32xf32>
    %cst_73 = arith.constant -1.800000e+00 : f32
    %268 = vector.broadcast %cst_73 : f32 to vector<8x32xf32>
    %269 = arith.subf %256, %268 : vector<8x32xf32>
    %cst_74 = arith.constant -1.400000e+00 : f32
    %270 = vector.broadcast %cst_74 : f32 to vector<8x32xf32>
    %271 = arith.subf %256, %270 : vector<8x32xf32>
    %cst_75 = arith.constant -1.000000e+00 : f32
    %272 = vector.broadcast %cst_75 : f32 to vector<8x32xf32>
    %273 = arith.subf %256, %272 : vector<8x32xf32>
    %cst_76 = arith.constant -6.000000e-01 : f32
    %274 = vector.broadcast %cst_76 : f32 to vector<8x32xf32>
    %275 = arith.subf %256, %274 : vector<8x32xf32>
    %cst_77 = arith.constant -0.199999988 : f32
    %276 = vector.broadcast %cst_77 : f32 to vector<8x32xf32>
    %277 = arith.subf %256, %276 : vector<8x32xf32>
    %cst_78 = arith.constant 0.200000048 : f32
    %278 = vector.broadcast %cst_78 : f32 to vector<8x32xf32>
    %279 = arith.subf %256, %278 : vector<8x32xf32>
    %cst_79 = arith.constant 6.000000e-01 : f32
    %280 = vector.broadcast %cst_79 : f32 to vector<8x32xf32>
    %281 = arith.subf %256, %280 : vector<8x32xf32>
    %cst_80 = arith.constant 1.000000e+00 : f32
    %282 = vector.broadcast %cst_80 : f32 to vector<8x32xf32>
    %283 = arith.subf %256, %282 : vector<8x32xf32>
    %cst_81 = arith.constant 1.4000001 : f32
    %284 = vector.broadcast %cst_81 : f32 to vector<8x32xf32>
    %285 = arith.subf %256, %284 : vector<8x32xf32>
    %cst_82 = arith.constant 1.800000e+00 : f32
    %286 = vector.broadcast %cst_82 : f32 to vector<8x32xf32>
    %287 = arith.subf %256, %286 : vector<8x32xf32>
    %cst_83 = arith.constant 2.200000e+00 : f32
    %288 = vector.broadcast %cst_83 : f32 to vector<8x32xf32>
    %289 = arith.subf %256, %288 : vector<8x32xf32>
    %cst_84 = arith.constant 0.000000e+00 : f32
    %290 = vector.broadcast %cst_84 : f32 to vector<8x32xf32>
    %291 = arith.cmpf oge, %267, %290 : vector<8x32xf32>
    %cst_85 = arith.constant 0.000000e+00 : f32
    %292 = vector.broadcast %cst_85 : f32 to vector<8x32xf32>
    %293 = arith.cmpf olt, %269, %292 : vector<8x32xf32>
    %294 = arith.andi %291, %293 : vector<8x32xi1>
    %295 = arith.extui %294 : vector<8x32xi1> to vector<8x32xi32>
    %296 = arith.sitofp %295 : vector<8x32xi32> to vector<8x32xf32>
    %cst_86 = arith.constant 0.000000e+00 : f32
    %297 = vector.broadcast %cst_86 : f32 to vector<8x32xf32>
    %298 = arith.cmpf oge, %269, %297 : vector<8x32xf32>
    %cst_87 = arith.constant 0.000000e+00 : f32
    %299 = vector.broadcast %cst_87 : f32 to vector<8x32xf32>
    %300 = arith.cmpf olt, %271, %299 : vector<8x32xf32>
    %301 = arith.andi %298, %300 : vector<8x32xi1>
    %302 = arith.extui %301 : vector<8x32xi1> to vector<8x32xi32>
    %303 = arith.sitofp %302 : vector<8x32xi32> to vector<8x32xf32>
    %cst_88 = arith.constant 0.000000e+00 : f32
    %304 = vector.broadcast %cst_88 : f32 to vector<8x32xf32>
    %305 = arith.cmpf oge, %271, %304 : vector<8x32xf32>
    %cst_89 = arith.constant 0.000000e+00 : f32
    %306 = vector.broadcast %cst_89 : f32 to vector<8x32xf32>
    %307 = arith.cmpf olt, %273, %306 : vector<8x32xf32>
    %308 = arith.andi %305, %307 : vector<8x32xi1>
    %309 = arith.extui %308 : vector<8x32xi1> to vector<8x32xi32>
    %310 = arith.sitofp %309 : vector<8x32xi32> to vector<8x32xf32>
    %cst_90 = arith.constant 0.000000e+00 : f32
    %311 = vector.broadcast %cst_90 : f32 to vector<8x32xf32>
    %312 = arith.cmpf oge, %273, %311 : vector<8x32xf32>
    %cst_91 = arith.constant 0.000000e+00 : f32
    %313 = vector.broadcast %cst_91 : f32 to vector<8x32xf32>
    %314 = arith.cmpf olt, %275, %313 : vector<8x32xf32>
    %315 = arith.andi %312, %314 : vector<8x32xi1>
    %316 = arith.extui %315 : vector<8x32xi1> to vector<8x32xi32>
    %317 = arith.sitofp %316 : vector<8x32xi32> to vector<8x32xf32>
    %cst_92 = arith.constant 0.000000e+00 : f32
    %318 = vector.broadcast %cst_92 : f32 to vector<8x32xf32>
    %319 = arith.cmpf oge, %275, %318 : vector<8x32xf32>
    %cst_93 = arith.constant 0.000000e+00 : f32
    %320 = vector.broadcast %cst_93 : f32 to vector<8x32xf32>
    %321 = arith.cmpf olt, %277, %320 : vector<8x32xf32>
    %322 = arith.andi %319, %321 : vector<8x32xi1>
    %323 = arith.extui %322 : vector<8x32xi1> to vector<8x32xi32>
    %324 = arith.sitofp %323 : vector<8x32xi32> to vector<8x32xf32>
    %cst_94 = arith.constant 0.000000e+00 : f32
    %325 = vector.broadcast %cst_94 : f32 to vector<8x32xf32>
    %326 = arith.cmpf oge, %277, %325 : vector<8x32xf32>
    %cst_95 = arith.constant 0.000000e+00 : f32
    %327 = vector.broadcast %cst_95 : f32 to vector<8x32xf32>
    %328 = arith.cmpf olt, %279, %327 : vector<8x32xf32>
    %329 = arith.andi %326, %328 : vector<8x32xi1>
    %330 = arith.extui %329 : vector<8x32xi1> to vector<8x32xi32>
    %331 = arith.sitofp %330 : vector<8x32xi32> to vector<8x32xf32>
    %cst_96 = arith.constant 0.000000e+00 : f32
    %332 = vector.broadcast %cst_96 : f32 to vector<8x32xf32>
    %333 = arith.cmpf oge, %279, %332 : vector<8x32xf32>
    %cst_97 = arith.constant 0.000000e+00 : f32
    %334 = vector.broadcast %cst_97 : f32 to vector<8x32xf32>
    %335 = arith.cmpf olt, %281, %334 : vector<8x32xf32>
    %336 = arith.andi %333, %335 : vector<8x32xi1>
    %337 = arith.extui %336 : vector<8x32xi1> to vector<8x32xi32>
    %338 = arith.sitofp %337 : vector<8x32xi32> to vector<8x32xf32>
    %cst_98 = arith.constant 0.000000e+00 : f32
    %339 = vector.broadcast %cst_98 : f32 to vector<8x32xf32>
    %340 = arith.cmpf oge, %281, %339 : vector<8x32xf32>
    %cst_99 = arith.constant 0.000000e+00 : f32
    %341 = vector.broadcast %cst_99 : f32 to vector<8x32xf32>
    %342 = arith.cmpf olt, %283, %341 : vector<8x32xf32>
    %343 = arith.andi %340, %342 : vector<8x32xi1>
    %344 = arith.extui %343 : vector<8x32xi1> to vector<8x32xi32>
    %345 = arith.sitofp %344 : vector<8x32xi32> to vector<8x32xf32>
    %cst_100 = arith.constant 0.000000e+00 : f32
    %346 = vector.broadcast %cst_100 : f32 to vector<8x32xf32>
    %347 = arith.cmpf oge, %283, %346 : vector<8x32xf32>
    %cst_101 = arith.constant 0.000000e+00 : f32
    %348 = vector.broadcast %cst_101 : f32 to vector<8x32xf32>
    %349 = arith.cmpf olt, %285, %348 : vector<8x32xf32>
    %350 = arith.andi %347, %349 : vector<8x32xi1>
    %351 = arith.extui %350 : vector<8x32xi1> to vector<8x32xi32>
    %352 = arith.sitofp %351 : vector<8x32xi32> to vector<8x32xf32>
    %cst_102 = arith.constant 0.000000e+00 : f32
    %353 = vector.broadcast %cst_102 : f32 to vector<8x32xf32>
    %354 = arith.cmpf oge, %285, %353 : vector<8x32xf32>
    %cst_103 = arith.constant 0.000000e+00 : f32
    %355 = vector.broadcast %cst_103 : f32 to vector<8x32xf32>
    %356 = arith.cmpf olt, %287, %355 : vector<8x32xf32>
    %357 = arith.andi %354, %356 : vector<8x32xi1>
    %358 = arith.extui %357 : vector<8x32xi1> to vector<8x32xi32>
    %359 = arith.sitofp %358 : vector<8x32xi32> to vector<8x32xf32>
    %cst_104 = arith.constant 0.000000e+00 : f32
    %360 = vector.broadcast %cst_104 : f32 to vector<8x32xf32>
    %361 = arith.cmpf oge, %287, %360 : vector<8x32xf32>
    %cst_105 = arith.constant 0.000000e+00 : f32
    %362 = vector.broadcast %cst_105 : f32 to vector<8x32xf32>
    %363 = arith.cmpf olt, %289, %362 : vector<8x32xf32>
    %364 = arith.andi %361, %363 : vector<8x32xi1>
    %365 = arith.extui %364 : vector<8x32xi1> to vector<8x32xi32>
    %366 = arith.sitofp %365 : vector<8x32xi32> to vector<8x32xf32>
    %367 = arith.mulf %267, %296 : vector<8x32xf32>
    %368 = arith.mulf %271, %303 : vector<8x32xf32>
    %369 = arith.subf %367, %368 : vector<8x32xf32>
    %cst_106 = arith.constant 2.500000e+00 : f32
    %370 = vector.broadcast %cst_106 : f32 to vector<8x32xf32>
    %371 = arith.mulf %370, %369 : vector<8x32xf32>
    %372 = arith.mulf %269, %303 : vector<8x32xf32>
    %373 = arith.mulf %273, %310 : vector<8x32xf32>
    %374 = arith.subf %372, %373 : vector<8x32xf32>
    %cst_107 = arith.constant 2.500000e+00 : f32
    %375 = vector.broadcast %cst_107 : f32 to vector<8x32xf32>
    %376 = arith.mulf %375, %374 : vector<8x32xf32>
    %377 = arith.mulf %271, %310 : vector<8x32xf32>
    %378 = arith.mulf %275, %317 : vector<8x32xf32>
    %379 = arith.subf %377, %378 : vector<8x32xf32>
    %cst_108 = arith.constant 2.500000e+00 : f32
    %380 = vector.broadcast %cst_108 : f32 to vector<8x32xf32>
    %381 = arith.mulf %380, %379 : vector<8x32xf32>
    %382 = arith.mulf %273, %317 : vector<8x32xf32>
    %383 = arith.mulf %277, %324 : vector<8x32xf32>
    %384 = arith.subf %382, %383 : vector<8x32xf32>
    %cst_109 = arith.constant 2.500000e+00 : f32
    %385 = vector.broadcast %cst_109 : f32 to vector<8x32xf32>
    %386 = arith.mulf %385, %384 : vector<8x32xf32>
    %387 = arith.mulf %275, %324 : vector<8x32xf32>
    %388 = arith.mulf %279, %331 : vector<8x32xf32>
    %389 = arith.subf %387, %388 : vector<8x32xf32>
    %cst_110 = arith.constant 2.500000e+00 : f32
    %390 = vector.broadcast %cst_110 : f32 to vector<8x32xf32>
    %391 = arith.mulf %390, %389 : vector<8x32xf32>
    %392 = arith.mulf %277, %331 : vector<8x32xf32>
    %393 = arith.mulf %281, %338 : vector<8x32xf32>
    %394 = arith.subf %392, %393 : vector<8x32xf32>
    %cst_111 = arith.constant 2.500000e+00 : f32
    %395 = vector.broadcast %cst_111 : f32 to vector<8x32xf32>
    %396 = arith.mulf %395, %394 : vector<8x32xf32>
    %397 = arith.mulf %279, %338 : vector<8x32xf32>
    %398 = arith.mulf %283, %345 : vector<8x32xf32>
    %399 = arith.subf %397, %398 : vector<8x32xf32>
    %cst_112 = arith.constant 2.500000e+00 : f32
    %400 = vector.broadcast %cst_112 : f32 to vector<8x32xf32>
    %401 = arith.mulf %400, %399 : vector<8x32xf32>
    %402 = arith.mulf %281, %345 : vector<8x32xf32>
    %403 = arith.mulf %285, %352 : vector<8x32xf32>
    %404 = arith.subf %402, %403 : vector<8x32xf32>
    %cst_113 = arith.constant 2.500000e+00 : f32
    %405 = vector.broadcast %cst_113 : f32 to vector<8x32xf32>
    %406 = arith.mulf %405, %404 : vector<8x32xf32>
    %407 = arith.mulf %283, %352 : vector<8x32xf32>
    %408 = arith.mulf %287, %359 : vector<8x32xf32>
    %409 = arith.subf %407, %408 : vector<8x32xf32>
    %cst_114 = arith.constant 2.500000e+00 : f32
    %410 = vector.broadcast %cst_114 : f32 to vector<8x32xf32>
    %411 = arith.mulf %410, %409 : vector<8x32xf32>
    %412 = arith.mulf %285, %359 : vector<8x32xf32>
    %413 = arith.mulf %289, %366 : vector<8x32xf32>
    %414 = arith.subf %412, %413 : vector<8x32xf32>
    %cst_115 = arith.constant 2.500000e+00 : f32
    %415 = vector.broadcast %cst_115 : f32 to vector<8x32xf32>
    %416 = arith.mulf %415, %414 : vector<8x32xf32>
    %417 = arith.mulf %267, %371 : vector<8x32xf32>
    %418 = arith.mulf %273, %376 : vector<8x32xf32>
    %419 = arith.subf %417, %418 : vector<8x32xf32>
    %cst_116 = arith.constant 1.250000e+00 : f32
    %420 = vector.broadcast %cst_116 : f32 to vector<8x32xf32>
    %421 = arith.mulf %420, %419 : vector<8x32xf32>
    %422 = arith.mulf %269, %376 : vector<8x32xf32>
    %423 = arith.mulf %275, %381 : vector<8x32xf32>
    %424 = arith.subf %422, %423 : vector<8x32xf32>
    %cst_117 = arith.constant 1.250000e+00 : f32
    %425 = vector.broadcast %cst_117 : f32 to vector<8x32xf32>
    %426 = arith.mulf %425, %424 : vector<8x32xf32>
    %427 = arith.mulf %271, %381 : vector<8x32xf32>
    %428 = arith.mulf %277, %386 : vector<8x32xf32>
    %429 = arith.subf %427, %428 : vector<8x32xf32>
    %cst_118 = arith.constant 1.250000e+00 : f32
    %430 = vector.broadcast %cst_118 : f32 to vector<8x32xf32>
    %431 = arith.mulf %430, %429 : vector<8x32xf32>
    %432 = arith.mulf %273, %386 : vector<8x32xf32>
    %433 = arith.mulf %279, %391 : vector<8x32xf32>
    %434 = arith.subf %432, %433 : vector<8x32xf32>
    %cst_119 = arith.constant 1.250000e+00 : f32
    %435 = vector.broadcast %cst_119 : f32 to vector<8x32xf32>
    %436 = arith.mulf %435, %434 : vector<8x32xf32>
    %437 = arith.mulf %275, %391 : vector<8x32xf32>
    %438 = arith.mulf %281, %396 : vector<8x32xf32>
    %439 = arith.subf %437, %438 : vector<8x32xf32>
    %cst_120 = arith.constant 1.250000e+00 : f32
    %440 = vector.broadcast %cst_120 : f32 to vector<8x32xf32>
    %441 = arith.mulf %440, %439 : vector<8x32xf32>
    %442 = arith.mulf %277, %396 : vector<8x32xf32>
    %443 = arith.mulf %283, %401 : vector<8x32xf32>
    %444 = arith.subf %442, %443 : vector<8x32xf32>
    %cst_121 = arith.constant 1.250000e+00 : f32
    %445 = vector.broadcast %cst_121 : f32 to vector<8x32xf32>
    %446 = arith.mulf %445, %444 : vector<8x32xf32>
    %447 = arith.mulf %279, %401 : vector<8x32xf32>
    %448 = arith.mulf %285, %406 : vector<8x32xf32>
    %449 = arith.subf %447, %448 : vector<8x32xf32>
    %cst_122 = arith.constant 1.250000e+00 : f32
    %450 = vector.broadcast %cst_122 : f32 to vector<8x32xf32>
    %451 = arith.mulf %450, %449 : vector<8x32xf32>
    %452 = arith.mulf %281, %406 : vector<8x32xf32>
    %453 = arith.mulf %287, %411 : vector<8x32xf32>
    %454 = arith.subf %452, %453 : vector<8x32xf32>
    %cst_123 = arith.constant 1.250000e+00 : f32
    %455 = vector.broadcast %cst_123 : f32 to vector<8x32xf32>
    %456 = arith.mulf %455, %454 : vector<8x32xf32>
    %457 = arith.mulf %283, %411 : vector<8x32xf32>
    %458 = arith.mulf %289, %416 : vector<8x32xf32>
    %459 = arith.subf %457, %458 : vector<8x32xf32>
    %cst_124 = arith.constant 1.250000e+00 : f32
    %460 = vector.broadcast %cst_124 : f32 to vector<8x32xf32>
    %461 = arith.mulf %460, %459 : vector<8x32xf32>
    %462 = arith.mulf %267, %421 : vector<8x32xf32>
    %463 = arith.mulf %275, %426 : vector<8x32xf32>
    %464 = arith.subf %462, %463 : vector<8x32xf32>
    %cst_125 = arith.constant 0.833333313 : f32
    %465 = vector.broadcast %cst_125 : f32 to vector<8x32xf32>
    %466 = arith.mulf %465, %464 : vector<8x32xf32>
    %467 = arith.mulf %269, %426 : vector<8x32xf32>
    %468 = arith.mulf %277, %431 : vector<8x32xf32>
    %469 = arith.subf %467, %468 : vector<8x32xf32>
    %cst_126 = arith.constant 0.833333313 : f32
    %470 = vector.broadcast %cst_126 : f32 to vector<8x32xf32>
    %471 = arith.mulf %470, %469 : vector<8x32xf32>
    %472 = arith.mulf %271, %431 : vector<8x32xf32>
    %473 = arith.mulf %279, %436 : vector<8x32xf32>
    %474 = arith.subf %472, %473 : vector<8x32xf32>
    %cst_127 = arith.constant 0.833333313 : f32
    %475 = vector.broadcast %cst_127 : f32 to vector<8x32xf32>
    %476 = arith.mulf %475, %474 : vector<8x32xf32>
    %477 = arith.mulf %273, %436 : vector<8x32xf32>
    %478 = arith.mulf %281, %441 : vector<8x32xf32>
    %479 = arith.subf %477, %478 : vector<8x32xf32>
    %cst_128 = arith.constant 0.833333313 : f32
    %480 = vector.broadcast %cst_128 : f32 to vector<8x32xf32>
    %481 = arith.mulf %480, %479 : vector<8x32xf32>
    %482 = arith.mulf %275, %441 : vector<8x32xf32>
    %483 = arith.mulf %283, %446 : vector<8x32xf32>
    %484 = arith.subf %482, %483 : vector<8x32xf32>
    %cst_129 = arith.constant 0.833333313 : f32
    %485 = vector.broadcast %cst_129 : f32 to vector<8x32xf32>
    %486 = arith.mulf %485, %484 : vector<8x32xf32>
    %487 = arith.mulf %277, %446 : vector<8x32xf32>
    %488 = arith.mulf %285, %451 : vector<8x32xf32>
    %489 = arith.subf %487, %488 : vector<8x32xf32>
    %cst_130 = arith.constant 0.833333313 : f32
    %490 = vector.broadcast %cst_130 : f32 to vector<8x32xf32>
    %491 = arith.mulf %490, %489 : vector<8x32xf32>
    %492 = arith.mulf %279, %451 : vector<8x32xf32>
    %493 = arith.mulf %287, %456 : vector<8x32xf32>
    %494 = arith.subf %492, %493 : vector<8x32xf32>
    %cst_131 = arith.constant 0.833333313 : f32
    %495 = vector.broadcast %cst_131 : f32 to vector<8x32xf32>
    %496 = arith.mulf %495, %494 : vector<8x32xf32>
    %497 = arith.mulf %281, %456 : vector<8x32xf32>
    %498 = arith.mulf %289, %461 : vector<8x32xf32>
    %499 = arith.subf %497, %498 : vector<8x32xf32>
    %cst_132 = arith.constant 0.833333313 : f32
    %500 = vector.broadcast %cst_132 : f32 to vector<8x32xf32>
    %501 = arith.mulf %500, %499 : vector<8x32xf32>
    %502 = arith.truncf %466 : vector<8x32xf32> to vector<8x32xbf16>
    %503 = arith.truncf %471 : vector<8x32xf32> to vector<8x32xbf16>
    %504 = arith.truncf %476 : vector<8x32xf32> to vector<8x32xbf16>
    %505 = arith.truncf %481 : vector<8x32xf32> to vector<8x32xbf16>
    %506 = arith.truncf %486 : vector<8x32xf32> to vector<8x32xbf16>
    %507 = arith.truncf %491 : vector<8x32xf32> to vector<8x32xbf16>
    %508 = arith.truncf %496 : vector<8x32xf32> to vector<8x32xbf16>
    %509 = arith.truncf %501 : vector<8x32xf32> to vector<8x32xbf16>
    %510 = arith.truncf %265 : vector<8x32xf32> to vector<8x32xbf16>
    %511 = tpu.concatenate %502, %503, %504, %505, %506, %507, %508, %509, %510 in 1 : vector<8x32xbf16>, vector<8x32xbf16>, vector<8x32xbf16>, vector<8x32xbf16>, vector<8x32xbf16>, vector<8x32xbf16>, vector<8x32xbf16>, vector<8x32xbf16>, vector<8x32xbf16> -> vector<8x288xbf16>
    %cst_133 = arith.constant dense<0.000000e+00> : vector<8x128xf32>
    %512 = tpu.matmul %511, %257, %cst_133 {dimension_numbers = #tpu.dot_dimension_numbers<[1], [0], [0], [1], [0, 0, 1, 1], [], []>} : vector<8x288xbf16>, vector<288x128xbf16>, vector<8x128xf32> -> vector<8x128xf32>
    %c0_134 = arith.constant 0 : index
    %c0_135 = arith.constant 0 : index
    %513 = vector.load %arg4[%c0_134, %c0_135] : memref<8x128xf32, #tpu.memory_space<vmem>>, vector<8x128xf32>
    tpu.vector_store %arg4[%c0_134, %c0_135], %512 {strides = array<i32>} : memref<8x128xf32, #tpu.memory_space<vmem>>, vector<8x128xf32>,
    return
  }
  func.func @transform_0(%arg0: i32) -> (i32, i32) {
    %c0_i32 = arith.constant 0 : i32
    %c0_i32_0 = arith.constant 0 : i32
    return %arg0, %c0_i32 : i32, i32
  }
  func.func @transform_1(%arg0: i32) -> (i32, i32) {
    %c0_i32 = arith.constant 0 : i32
    %c0_i32_0 = arith.constant 0 : i32
    %c0_i32_1 = arith.constant 0 : i32
    return %c0_i32, %c0_i32_0 : i32, i32
  }
  func.func @transform_2(%arg0: i32) -> (i32, i32) {
    %c0_i32 = arith.constant 0 : i32
    %c0_i32_0 = arith.constant 0 : i32
    %c0_i32_1 = arith.constant 0 : i32
    return %c0_i32, %c0_i32_0 : i32, i32
  }
  func.func @transform_3(%arg0: i32) -> (i32, i32) {
    %c0_i32 = arith.constant 0 : i32
    %c0_i32_0 = arith.constant 0 : i32
    return %arg0, %c0_i32 : i32, i32
  }
}

</mosaic_0001>

<bundles_post_ra>
// kernel: tpu_custom_call.1
= control target key start
LH: loop header
LB: loop body
LE: loop exit
PB: predicated region body
PF: predicated region fallthrough
CT: control target
= control target key end

     0   :  { %8 = vsyncpa [#allocation3], 0  ;;  %s1458_s0 = inlined_call_operand.vmem [shape: f32[8,16], index: 0, kind: input, shape index: {}]   ;;  %s1459_s1 = inlined_call_operand.vmem [shape: bf16[144,32], index: 1, kind: input, shape index: {}]   ;;  %s1460_s2 = inlined_call_operand.hbm [shape: bf16[288,128], index: 2, kind: input, shape index: {}]   ;;  %s1461_s3 = inlined_call_operand.hbm [shape: f32[8,128], index: 3, kind: output, shape index: {}]  }
   0x1   :  { %9 = vsyncpa [#allocation4], 0  ;;  %s1053_s12 = smov [#allocation2]   ;;  %s1005_s16 = scalar_lea.hbm %s1460_s2, 2304 }
   0x2   :  { %s19_s13 = sshll.u32 %s1053_s12, 4  ;;  %p1006_p0 = scmp.ne.s32.totalorder %s1460_s2, %s1005_s16  ;;  %s20_s13 = int_to_ptr.vmem [resolvable:$true] %s19_s13 }
   0x3   :  { %p1009_p1 = scmp.lt.u32.totalorder %s1005_s16, %s1460_s2 }
   0x5   :  { %p1011_p2 = pnand %p1009_p1, %p1006_p0 }
   0x7   :  { %1014 = shalt.err (!%p1011_p2)
}
   0x8   :  { %s1015_s21 = scalar_lea.vmem %s20_s13, 2304  ;;  %p1020_p4 = scmp.lt.s32.totalorder %s20_s13, %s20_s13 }
   0x9   :  { %p1016_p3 = scmp.ne.s32.totalorder %s20_s13, %s1015_s21  ;;  %p1021_p5 = scmp.lt.s32.totalorder %s1015_s21, %s1015_s21 }
   0xb   :  { %p1022_p6 = por %p1021_p5, %p1020_p4 }
   0xd   :  { %p1023_p7 = pnand %p1022_p6, %p1016_p3 }
   0xf   :  { %1026 = shalt.err (!%p1023_p7)
}
  0x10   :  { %s1054_s22 = smov 64   ;;  %s1055_s23 = smov 4  }
  0x11   :  { %25 = dma.hbm_to_vmem [thread:$0]  %s1460_s2, 2304, %s20_s13, [#allocation3], %s1054_s22, %s1054_s22, %s1055_s23  }
  0x12   :  { %1049 = dma.done.wait [#allocation3], 2304  }
  0x13   :  { %1050 = vsyncadd [#allocation3], 4294964992  ;;  %v1056_v0 = vmov 0   ;;  %v1104_v1 = vld [vmem:[%s1458_s0] sm:$0xff]  ;;  %v1057_v10 = vmov 0.0   ;;  %v971_v13 = vld [vmem:[%s1459_s1 + $0x8] sm:$0xff]  }
  0x14   :  { %341 = vmatprep.subr.bf16.mxu0 %v1056_v0  ;;  %v1107_v2 = vadd.f32 1.8, %v1104_v1  ;;  %v1110_v3 = vadd.f32 1.4, %v1104_v1  ;;  %v1113_v4 = vadd.f32 1.0, %v1104_v1  ;;  %v1116_v5 = vadd.f32 -1.0, %v1104_v1 }
  0x15   :  { %v1119_v6 = vadd.f32 0.6, %v1104_v1  ;;  %v1122_v7 = vadd.f32 0.19999999, %v1104_v1  ;;  %v1125_v8 = vadd.f32 -0.20000005, %v1104_v1 }
  0x16   :  { %vm73_vm0 = vcmp.ge.f32.partialorder %v1107_v2, 0.0  ;;  %vm74_vm1 = vcmp.lt.f32.partialorder %v1110_v3, 0.0  ;;  %vm78_vm2 = vcmp.ge.f32.partialorder %v1110_v3, 0.0  ;;  %vm79_vm3 = vcmp.lt.f32.partialorder %v1113_v4, 0.0  ;;  %v970_v9 = vld [vmem:[%s1459_s1] sm:$0xff]   ;;  %v972_v23 = vld [vmem:[%s1459_s1 + $0x10] sm:$0xff]  }
  0x17   :  { %vm75_vm4 = vmand %vm73_vm0, %vm74_vm1  ;;  %vm83_vm5 = vcmp.ge.f32.partialorder %v1113_v4, 0.0  ;;  %vm84_vm6 = vcmp.lt.f32.partialorder %v1119_v6, 0.0  ;;  %vm88_vm7 = vcmp.ge.f32.partialorder %v1119_v6, 0.0  ;;  %vm89_vm8 = vcmp.lt.f32.partialorder %v1122_v7, 0.0  ;;  %342 = vmatpush1.bf16.msra.mxu0 %v970_v9  ;;  %v973_v43 = vld [vmem:[%s1459_s1 + $0x18] sm:$0xff]   ;;  %v974_v60 = vld [vmem:[%s1459_s1 + $0x20] sm:$0xff]  }
  0x18   :  { %v862_v11 = vsel %vm75_vm4, 1.0, %v1057_v10  ;;  %vm80_vm9 = vmand %vm78_vm2, %vm79_vm3  ;;  %v1140_v12 = vadd.f32 -0.6, %v1104_v1  ;;  %vm93_vm10 = vcmp.ge.f32.partialorder %v1122_v7, 0.0  ;;  %vm94_vm11 = vcmp.lt.f32.partialorder %v1125_v8, 0.0  ;;  %343 = vmatprep.subr.bf16.mxu0 %v1056_v0  ;;  %s1058_s15 = smov 16  }
  0x19   :  { %v863_v14 = vsel %vm80_vm9, 1.0, %v1057_v10  ;;  %vm85_vm12 = vmand %vm83_vm5, %vm84_vm6  ;;  %v127_v15 = vmul.f32 %v862_v11, %v1107_v2  ;;  %v1150_v16 = vmul.f32 %v862_v11, %v1110_v3  ;;  %vm98_vm13 = vcmp.ge.f32.partialorder %v1125_v8, 0.0  ;;  %s1059_s16 = smov 48   ;;  %s1060_s17 = smov 32  }
  0x1a   :  { %v864_v17 = vsel %vm85_vm12, 1.0, %v1057_v10  ;;  %vm90_vm14 = vmand %vm88_vm7, %vm89_vm8  ;;  %v128_v18 = vmul.f32 %v863_v14, %v1113_v4  ;;  %v131_v19 = vmul.f32 %v863_v14, %v1110_v3  ;;  %vm99_vm15 = vcmp.lt.f32.partialorder %v1140_v12, 0.0  ;;  %s1062_s20 = smov 96   ;;  %s1063_s21 = smov 112  }
  0x1b   :  { %v865_v20 = vsel %vm90_vm14, 1.0, %v1057_v10  ;;  %v132_v21 = vmul.f32 %v864_v17, %v1119_v6  ;;  %v135_v22 = vmul.f32 %v864_v17, %v1113_v4  ;;  %vm95_vm0 = vmand %vm93_vm10, %vm94_vm11  ;;  %vm103_vm1 = vcmp.ge.f32.partialorder %v1140_v12, 0.0  ;;  %344 = vmatpush1.bf16.msra.mxu0 %v971_v13 }
  0x1c   :  { %v129_v24 = vsub.f32 %v127_v15, %v128_v18  ;;  %v136_v25 = vmul.f32 %v865_v20, %v1122_v7  ;;  %v866_v26 = vsel %vm95_vm0, 1.0, %v1057_v10  ;;  %vm100_vm2 = vmand %vm98_vm13, %vm99_vm15  ;;  %v139_v27 = vmul.f32 %v865_v20, %v1119_v6  ;;  %345 = vmatprep.subr.bf16.mxu0 %v1056_v0 }
  0x1d   :  { %v133_v28 = vsub.f32 %v131_v19, %v132_v21  ;;  %v867_v29 = vsel %vm100_vm2, 1.0, %v1057_v10  ;;  %v140_v30 = vmul.f32 %v866_v26, %v1125_v8  ;;  %v143_v31 = vmul.f32 %v866_v26, %v1122_v7 }
  0x1e   :  { %v130_v32 = vmul.f32 2.5, %v129_v24  ;;  %v137_v33 = vsub.f32 %v135_v22, %v136_v25  ;;  %v144_v34 = vmul.f32 %v867_v29, %v1140_v12  ;;  %vm104_vm3 = vcmp.lt.f32.partialorder %v1116_v5, 0.0 }
  0x1f   :  { %v134_v35 = vmul.f32 2.5, %v133_v28  ;;  %v141_v36 = vsub.f32 %v139_v27, %v140_v30  ;;  %vm105_vm4 = vmand %vm103_vm1, %vm104_vm3  ;;  %v147_v37 = vmul.f32 %v867_v29, %v1125_v8  ;;  %v1188_v38 = vadd.f32 -1.4000001, %v1104_v1  ;;  %346 = vmatpush1.bf16.msra.mxu0 %v972_v23  ;;  %v975_v23 = vld [vmem:[%s1459_s1 + $0x28] sm:$0xff]  }
  0x20   :  { %v138_v39 = vmul.f32 2.5, %v137_v33  ;;  %v167_v40 = vmul.f32 %v1107_v2, %v130_v32  ;;  %v1192_v41 = vmul.f32 %v1113_v4, %v130_v32  ;;  %v145_v42 = vsub.f32 %v143_v31, %v144_v34  ;;  %347 = vmatprep.subr.bf16.mxu0 %v1056_v0 }
  0x21   :  { %v168_v44 = vmul.f32 %v1119_v6, %v134_v35  ;;  %v171_v45 = vmul.f32 %v1110_v3, %v134_v35  ;;  %v142_v46 = vmul.f32 2.5, %v141_v36  ;;  %v868_v47 = vsel %vm105_vm4, 1.0, %v1057_v10  ;;  %v976_v36 = vld [vmem:[%s1459_s1 + $0x30] sm:$0xff]  }
  0x22   :  { %v172_v48 = vmul.f32 %v1122_v7, %v138_v39  ;;  %v146_v49 = vmul.f32 2.5, %v145_v42  ;;  %v175_v50 = vmul.f32 %v1113_v4, %v138_v39  ;;  %v148_v51 = vmul.f32 %v868_v47, %v1116_v5 }
  0x23   :  { %v169_v52 = vsub.f32 %v167_v40, %v168_v44  ;;  %v176_v53 = vmul.f32 %v1125_v8, %v142_v46  ;;  %v179_v54 = vmul.f32 %v1119_v6, %v142_v46  ;;  %v151_v55 = vmul.f32 %v868_v47, %v1140_v12  ;;  %348 = vmatpush1.bf16.msra.mxu0 %v973_v43  ;;  %v977_v46 = vld [vmem:[%s1459_s1 + $0x38] sm:$0xff]  }
  0x24   :  { %v173_v56 = vsub.f32 %v171_v45, %v172_v48  ;;  %v180_v57 = vmul.f32 %v1140_v12, %v146_v49  ;;  %v149_v58 = vsub.f32 %v147_v37, %v148_v51  ;;  %v183_v59 = vmul.f32 %v1122_v7, %v146_v49  ;;  %349 = vmatprep.subr.bf16.mxu0 %v1056_v0 }
  0x25   :  { %v170_v61 = vmul.f32 1.25, %v169_v52  ;;  %v177_v62 = vsub.f32 %v175_v50, %v176_v53  ;;  %vm108_vm5 = vcmp.ge.f32.partialorder %v1116_v5, 0.0  ;;  %vm109_vm6 = vcmp.lt.f32.partialorder %v1188_v38, 0.0 }
  0x26   :  { %v174_v63 = vmul.f32 1.25, %v173_v56  ;;  %v181_v9 = vsub.f32 %v179_v54, %v180_v57  ;;  %v150_v11 = vmul.f32 2.5, %v149_v58  ;;  %vm110_vm7 = vmand %vm108_vm5, %vm109_vm6  ;;  %v1216_v13 = vadd.f32 -1.8, %v1104_v1 }
  0x27   :  { %v203_v14 = vmul.f32 %v1107_v2, %v170_v61  ;;  %v1220_v15 = vmul.f32 %v1119_v6, %v170_v61  ;;  %v178_v17 = vmul.f32 1.25, %v177_v62  ;;  %v869_v18 = vsel %vm110_vm7, 1.0, %v1057_v10  ;;  %350 = vmatpush1.bf16.msra.mxu0 %v974_v60 }
  0x28   :  { %v204_v19 = vmul.f32 %v1122_v7, %v174_v63  ;;  %v182_v20 = vmul.f32 1.25, %v181_v9  ;;  %v207_v21 = vmul.f32 %v1110_v3, %v174_v63  ;;  %v184_v22 = vmul.f32 %v1116_v5, %v150_v11  ;;  %351 = vmatprep.subr.bf16.mxu0 %v1056_v0 }
  0x29   :  { %v211_v24 = vmul.f32 %v1113_v4, %v178_v17  ;;  %v208_v25 = vmul.f32 %v1125_v8, %v178_v17  ;;  %v152_v26 = vmul.f32 %v869_v18, %v1188_v38  ;;  %v187_v27 = vmul.f32 %v1125_v8, %v150_v11  ;;  %v978_v17 = vld [vmem:[%s1459_s1 + $0x40] sm:$0xff]   ;;  %s1061_s1 = smov 80  }
  0x2a   :  { %v205_v28 = vsub.f32 %v203_v14, %v204_v19  ;;  %v212_v3 = vmul.f32 %v1140_v12, %v182_v20  ;;  %v185_v29 = vsub.f32 %v183_v59, %v184_v22  ;;  %v215_v30 = vmul.f32 %v1119_v6, %v182_v20 }
  0x2b   :  { %v209_v31 = vsub.f32 %v207_v21, %v208_v25  ;;  %v153_v32 = vsub.f32 %v151_v55, %v152_v26  ;;  %vm113_vm8 = vcmp.ge.f32.partialorder %v1188_v38, 0.0  ;;  %vm114_vm9 = vcmp.lt.f32.partialorder %v1216_v13, 0.0  ;;  %352 = vmatpush1.bf16.msra.mxu0 %v975_v23 }
  0x2c   :  { %v206_v4 = vmul.f32 0.8333333, %v205_v28  ;;  %v213_v33 = vsub.f32 %v211_v24, %v212_v3  ;;  %v186_v34 = vmul.f32 1.25, %v185_v29  ;;  %vm115_vm10 = vmand %vm113_vm8, %vm114_vm9  ;;  %v155_v35 = vmul.f32 %v869_v18, %v1116_v5  ;;  %353 = vmatprep.subr.bf16.mxu0 %v1056_v0 }
  0x2d   :  { %v210_v37 = vmul.f32 0.8333333, %v209_v31  ;;  %v154_v39 = vmul.f32 2.5, %v153_v32  ;;  %v870_v6 = vsel %vm115_vm10, 1.0, %v1057_v10  ;;  %v1244_v40 = vadd.f32 -2.2, %v1104_v1 }
  0x2e   :  { %v232_v42 = vpack.c.bf16 %v206_v4, %v206_v4  ;;  %v214_v43 = vmul.f32 0.8333333, %v213_v33  ;;  %v216_v44 = vmul.f32 %v1116_v5, %v186_v34  ;;  %v219_v45 = vmul.f32 %v1122_v7, %v186_v34 }
  0x2f   :  { %v233_v47 = vpack.c.bf16 %v210_v37, %v210_v37  ;;  %v188_v48 = vmul.f32 %v1188_v38, %v154_v39  ;;  %v156_v49 = vmul.f32 %v870_v6, %v1216_v13  ;;  %v191_v50 = vmul.f32 %v1140_v12, %v154_v39  ;;  %354 = vmatpush1.bf16.msra.mxu0 %v976_v36 }
  0x30   :  { %241 = vrot.lane.b32.xlu0 %v232_v42, %s1058_s15  ;;  %v234_v51 = vpack.c.bf16 %v214_v43, %v214_v43  ;;  %v217_v52 = vsub.f32 %v215_v30, %v216_v44  ;;  %vm118_vm11 = vcmp.ge.f32.partialorder %v1216_v13, 0.0  ;;  %vm119_vm12 = vcmp.lt.f32.partialorder %v1244_v40, 0.0  ;;  %355 = vmatprep.subr.bf16.mxu0 %v1056_v0 }
  0x31   :  { %v189_v7 = vsub.f32 %v187_v27, %v188_v48  ;;  %v157_v53 = vsub.f32 %v155_v35, %v156_v49  ;;  %vm120_vm13 = vmand %vm118_vm11, %vm119_vm12  ;;  %v159_v54 = vmul.f32 %v870_v6, %v1188_v38  ;;  %v49_v55 = vsub.f32 0.0, %v1104_v1 }
  0x32   :  { %247 = vrot.lane.b32.xlu1 %v234_v51, %s1059_s16  ;;  %v218_v56 = vmul.f32 0.8333333, %v217_v52  ;;  %v871_v57 = vsel %vm120_vm13, 1.0, %v1057_v10  ;;  %v849_v58 = vadd.f32 2.2, %v1104_v1  ;;  %vm69_vm14 = vcmp.lt.f32.partialorder %v1107_v2, 0.0 }
  0x33   :  { %v190_v59 = vmul.f32 1.25, %v189_v7  ;;  %v158_v60 = vmul.f32 2.5, %v157_v53  ;;  %v160_v61 = vmul.f32 %v871_v57, %v1244_v40  ;;  %v50_v62 = vmul.f32 1.442695, %v49_v55  ;;  %356 = vmatpush1.bf16.msra.mxu0 %v977_v46  ;;  %v979_v55 = vld [vmem:[#allocation2 + $0x40] sm:$0xff]   ;;  %v981_v57 = vld [vmem:[#allocation2 + $0x48] sm:$0xff]  }
  0x34   :  { %244 = vrot.lane.b32.xlu0 %v233_v47, %s1060_s17  ;;  %v235_v63 = vpack.c.bf16 %v218_v56, %v218_v56  ;;  %vm68_vm15 = vcmp.ge.f32.partialorder %v849_v58, 0.0  ;;  %357 = vmatprep.subr.bf16.mxu0 %v1056_v0  ;;  %vm261_vm1 = vcmask 130048   ;;  %vm265_vm2 = vcmask 261120   ;;  %v980_v56 = vld [vmem:[#allocation2] sm:$0xff]  }
  0x35   :  { %v220_v9 = vmul.f32 %v1188_v38, %v190_v59  ;;  %v192_v11 = vmul.f32 %v1216_v13, %v158_v60  ;;  %v161_v14 = vsub.f32 %v159_v54, %v160_v61  ;;  %vm70_vm0 = vmand %vm68_vm15, %vm69_vm14  ;;  %v195_v18 = vmul.f32 %v1116_v5, %v158_v60  ;;  %924 = vmatprep.subr.bf16.mxu1 %v979_v55  ;;  %v984_v60 = vld [vmem:[#allocation2 + $0x10] sm:$0xff]   ;;  %v985_v61 = vld [vmem:[#allocation2 + $0x58] sm:$0xff]  }
  0x36   :  { %250 = vrot.lane.b32.xlu1 %v235_v63, %s1054_s22  ;;  %997 = vpow2.f32 %v50_v62  ;;  %v861_v19 = vsel %vm70_vm0, 1.0, %v1057_v10  ;;  %v223_v0 = vmul.f32 %v1125_v8, %v190_v59  ;;  %vm268_vm3 = vcmask 392192   ;;  %925 = vmatpush3.bf16.msra.mxu1 %v980_v56  ;;  %v983_v59 = vld [vmem:[#allocation2 + $0x50] sm:$0xff]   ;;  %v986_v62 = vld [vmem:[#allocation2 + $0x18] sm:$0xff]   ;;  %v987_v63 = vld [vmem:[#allocation2 + $0x60] sm:$0xff]  }
  0x37   :  { %v221_v38 = vsub.f32 %v219_v45, %v220_v9  ;;  %v193_v20 = vsub.f32 %v191_v50, %v192_v11  ;;  %v162_v21 = vmul.f32 2.5, %v161_v14  ;;  %v123_v22 = vmul.f32 %v861_v19, %v849_v58  ;;  %358 = vmatpush1.bf16.msra.mxu0 %v978_v17  ;;  %926 = vmatprep.subr.bf16.mxu1 %v981_v57  ;;  %v988_v9 = vld [vmem:[#allocation2 + $0x20] sm:$0xff]   ;;  %v989_v11 = vld [vmem:[#allocation2 + $0x68] sm:$0xff]  }
  0x38   :  { %vm271_vm4 = vcmask 523264   ;;  %vm274_vm5 = vcmask 654336   ;;  %vm277_vm6 = vcmask 785408   ;;  %vm280_vm7 = vcmask 916480   ;;  %v990_v14 = vld [vmem:[#allocation2 + $0x28] sm:$0xff]  }
  0x39   :  { %v222_v23 = vmul.f32 0.8333333, %v221_v38  ;;  %v194_v24 = vmul.f32 1.25, %v193_v20  ;;  %v196_v25 = vmul.f32 %v1244_v40, %v162_v21  ;;  %v125_v2 = vsub.f32 %v123_v22, %v1150_v16 }
  0x3b   :  { %v236_v26 = vpack.c.bf16 %v222_v23, %v222_v23  ;;  %v224_v27 = vmul.f32 %v1216_v13, %v194_v24  ;;  %v197_v5 = vsub.f32 %v195_v18, %v196_v25  ;;  %v126_v28 = vmul.f32 2.5, %v125_v2 }
  0x3c   :  { %v227_v30 = vmul.f32 %v1140_v12, %v194_v24 }
  0x3d   :  { %253 = vrot.lane.b32.xlu0 %v236_v26, %s1061_s1  ;;  %v225_v3 = vsub.f32 %v223_v0, %v224_v27  ;;  %v198_v29 = vmul.f32 1.25, %v197_v5  ;;  %v163_v31 = vmul.f32 %v849_v58, %v126_v28 }
  0x3f   :  { %v226_v8 = vmul.f32 0.8333333, %v225_v3  ;;  %v228_v32 = vmul.f32 %v1244_v40, %v198_v29  ;;  %v165_v33 = vsub.f32 %v163_v31, %v1192_v41 }
  0x40   :  { %v998_v4 = vpop.eup %997 }
  0x41   :  { %v237_v34 = vpack.c.bf16 %v226_v8, %v226_v8  ;;  %v229_v16 = vsub.f32 %v227_v30, %v228_v32  ;;  %v52_v35 = vadd.f32 1.0, %v998_v4  ;;  %v166_v36 = vmul.f32 1.25, %v165_v33 }
  0x43   :  { %256 = vrot.lane.b32.xlu1 %v237_v34, %s1062_s20  ;;  %v230_v13 = vmul.f32 0.8333333, %v229_v16  ;;  %999 = vrcp.f32 %v52_v35  ;;  %v199_v37 = vmul.f32 %v849_v58, %v166_v36  ;;  %v982_v58 = vld [vmem:[#allocation2 + $0x8] sm:$0xff]  }
  0x44   :  { %927 = vmatpush3.bf16.msra.mxu1 %v982_v58 }
  0x45   :  { %v238_v39 = vpack.c.bf16 %v230_v13, %v230_v13  ;;  %v201_v12 = vsub.f32 %v199_v37, %v1220_v15  ;;  %928 = vmatprep.subr.bf16.mxu1 %v983_v59 }
  0x47   :  { %259 = vrot.lane.b32.xlu0 %v238_v39, %s1063_s21  ;;  %v202_v43 = vmul.f32 0.8333333, %v201_v12 }
  0x48   :  { %929 = vmatpush3.bf16.msra.mxu1 %v984_v60 }
  0x49   :  { %v231_v44 = vpack.c.bf16 %v202_v43, %v202_v43  ;;  %930 = vmatprep.subr.bf16.mxu1 %v985_v61 }
  0x4c   :  { %931 = vmatpush3.bf16.msra.mxu1 %v986_v62 }
  0x4d   :  { %v1000_v6 = vpop.eup %999  ;;  %932 = vmatprep.subr.bf16.mxu1 %v987_v63 }
  0x4e   :  { %v55_v40 = vmul.f32 %v1000_v6, %v1104_v1 }
  0x50   :  { %v239_v42 = vpack.c.bf16 %v55_v40, %v55_v40  ;;  %933 = vmatpush3.bf16.msra.mxu1 %v988_v9 }
  0x51   :  { %934 = vmatprep.subr.bf16.mxu1 %v989_v11 }
  0x52   :  { %881 = vmatprep.mubr.msk.bf16.mxu0 %vm261_vm1, %v239_v42 }
  0x54   :  { %935 = vmatpush3.bf16.msra.mxu1 %v990_v14 }
  0xa2   :  { %v242_v41 = vpop.permute.xlu0 %241 }
  0xa3   :  { %v264_v47 = vsel %vm261_vm1, %v231_v44, %v242_v41 }
  0xa4   :  { %v248_v45 = vpop.permute.xlu1 %247 }
  0xa6   :  { %v245_v46 = vpop.permute.xlu0 %244 }
  0xa7   :  { %v267_v48 = vsel %vm265_vm2, %v264_v47, %v245_v46 }
  0xa8   :  { %v251_v49 = vpop.permute.xlu1 %250  ;;  %v270_v15 = vsel %vm268_vm3, %v267_v48, %v248_v45 }
  0xa9   :  { %v273_v51 = vsel %vm271_vm4, %v270_v15, %v251_v49 }
  0xaf   :  { %v254_v50 = vpop.permute.xlu0 %253 }
  0xb0   :  { %v276_v52 = vsel %vm274_vm5, %v273_v51, %v254_v50 }
  0xb5   :  { %v257_v1 = vpop.permute.xlu1 %256 }
  0xb6   :  { %v279_v53 = vsel %vm277_vm6, %v276_v52, %v257_v1 }
  0xb9   :  { %v260_v7 = vpop.permute.xlu0 %259 }
  0xba   :  { %v282_v54 = vsel %vm280_vm7, %v279_v53, %v260_v7 }
  0xbb   :  { %374 = vmatmul.mubr.bf16.vlgmr.msra.gmra.mrb[0].mxu0 %v282_v54 }
 0x18e   :  { %v1289_v17 = vpop.f32.mrb[0].mxu0 }
 0x18f   :  { %v377_v18 = vpop.f32.mrb[1].mxu0  ;;  %v1292_v19 = vadd.f32 0.19999999, %v1289_v17  ;;  %v1295_v38 = vadd.f32 -0.20000005, %v1289_v17  ;;  %v1298_v20 = vadd.f32 -1.0, %v1289_v17 }
 0x190   :  { %v378_v21 = vpop.f32.mrb[2].mxu0  ;;  %v1301_v22 = vadd.f32 -0.6, %v1289_v17  ;;  %v1304_v0 = vadd.f32 -1.4000001, %v1289_v17  ;;  %v1307_v23 = vadd.f32 1.0, %v1289_v17 }
 0x191   :  { %v379_v24 = vpop.f32.mrb[3].mxu0  ;;  %vm461_vm8 = vcmp.ge.f32.partialorder %v1292_v19, 0.0  ;;  %vm462_vm9 = vcmp.lt.f32.partialorder %v1295_v38, 0.0  ;;  %vm466_vm10 = vcmp.ge.f32.partialorder %v1295_v38, 0.0  ;;  %vm472_vm11 = vcmp.lt.f32.partialorder %v1298_v20, 0.0 }
 0x192   :  { %vm463_vm12 = vmand %vm461_vm8, %vm462_vm9  ;;  %vm467_vm13 = vcmp.lt.f32.partialorder %v1301_v22, 0.0  ;;  %vm471_vm14 = vcmp.ge.f32.partialorder %v1301_v22, 0.0  ;;  %vm476_vm15 = vcmp.ge.f32.partialorder %v1298_v20, 0.0  ;;  %vm477_vm0 = vcmp.lt.f32.partialorder %v1304_v0, 0.0 }
 0x193   :  { %v1318_v25 = vsel %vm463_vm12, 1.0, %v1057_v10  ;;  %vm468_vm1 = vmand %vm466_vm10, %vm467_vm13  ;;  %v1321_v2 = vadd.f32 1.8, %v1289_v17  ;;  %v1324_v26 = vadd.f32 1.4, %v1289_v17  ;;  %vm447_vm3 = vcmp.lt.f32.partialorder %v1307_v23, 0.0 }
 0x194   :  { %v900_v27 = vsel %vm468_vm1, 1.0, %v1057_v10  ;;  %vm473_vm5 = vmand %vm471_vm14, %vm472_vm11  ;;  %v511_v5 = vmul.f32 %v1318_v25, %v1292_v19  ;;  %v1331_v28 = vadd.f32 0.6, %v1289_v17  ;;  %vm451_vm7 = vcmp.ge.f32.partialorder %v1307_v23, 0.0 }
 0x195   :  { %v901_v3 = vsel %vm473_vm5, 1.0, %v1057_v10  ;;  %vm478_vm8 = vmand %vm476_vm15, %vm477_vm0  ;;  %v512_v29 = vmul.f32 %v900_v27, %v1301_v22  ;;  %v515_v30 = vmul.f32 %v900_v27, %v1295_v38  ;;  %vm441_vm9 = vcmp.ge.f32.partialorder %v1321_v2, 0.0 }
 0x196   :  { %v902_v31 = vsel %vm478_vm8, 1.0, %v1057_v10  ;;  %v516_v8 = vmul.f32 %v901_v3, %v1298_v20  ;;  %v519_v32 = vmul.f32 %v901_v3, %v1301_v22  ;;  %vm442_vm10 = vcmp.lt.f32.partialorder %v1324_v26, 0.0 }
 0x197   :  { %v513_v4 = vsub.f32 %v511_v5, %v512_v29  ;;  %v520_v33 = vmul.f32 %v902_v31, %v1304_v0  ;;  %vm443_vm11 = vmand %vm441_vm9, %vm442_vm10  ;;  %vm446_vm12 = vcmp.ge.f32.partialorder %v1324_v26, 0.0  ;;  %vm452_vm13 = vcmp.lt.f32.partialorder %v1331_v28, 0.0 }
 0x198   :  { %v517_v34 = vsub.f32 %v515_v30, %v516_v8  ;;  %v895_v16 = vsel %vm443_vm11, 1.0, %v1057_v10  ;;  %vm448_vm14 = vmand %vm446_vm12, %vm447_vm3  ;;  %vm456_vm15 = vcmp.ge.f32.partialorder %v1331_v28, 0.0  ;;  %vm457_vm0 = vcmp.lt.f32.partialorder %v1292_v19, 0.0  ;;  %v992_v8 = vld [vmem:[#allocation2 + $0x30] sm:$0xff]  }
 0x199   :  { %v514_v35 = vmul.f32 2.5, %v513_v4  ;;  %v521_v36 = vsub.f32 %v519_v32, %v520_v33  ;;  %v896_v13 = vsel %vm448_vm14, 1.0, %v1057_v10  ;;  %vm453_vm1 = vmand %vm451_vm7, %vm452_vm13  ;;  %v495_v37 = vmul.f32 %v895_v16, %v1321_v2 }
 0x19a   :  { %v518_v39 = vmul.f32 2.5, %v517_v34  ;;  %v897_v12 = vsel %vm453_vm1, 1.0, %v1057_v10  ;;  %vm458_vm5 = vmand %vm456_vm15, %vm457_vm0  ;;  %v496_v6 = vmul.f32 %v896_v13, %v1307_v23  ;;  %v499_v40 = vmul.f32 %v896_v13, %v1324_v26 }
 0x19b   :  { %v522_v42 = vmul.f32 2.5, %v521_v36  ;;  %v551_v41 = vmul.f32 %v1292_v19, %v514_v35  ;;  %v898_v43 = vsel %vm458_vm5, 1.0, %v1057_v10  ;;  %v500_v44 = vmul.f32 %v897_v12, %v1331_v28 }
 0x19c   :  { %v552_v45 = vmul.f32 %v1298_v20, %v518_v39  ;;  %v555_v46 = vmul.f32 %v1295_v38, %v518_v39  ;;  %v497_v47 = vsub.f32 %v495_v37, %v496_v6  ;;  %v503_v48 = vmul.f32 %v897_v12, %v1307_v23 }
 0x19d   :  { %v556_v49 = vmul.f32 %v1304_v0, %v522_v42  ;;  %v501_v15 = vsub.f32 %v499_v40, %v500_v44  ;;  %v504_v50 = vmul.f32 %v898_v43, %v1292_v19  ;;  %v1366_v51 = vmul.f32 %v895_v16, %v1324_v26 }
 0x19e   :  { %v553_v1 = vsub.f32 %v551_v41, %v552_v45  ;;  %v1368_v52 = vmul.f32 2.5, %v497_v47  ;;  %v1371_v7 = vadd.f32 -1.8, %v1289_v17  ;;  %vm481_vm3 = vcmp.ge.f32.partialorder %v1304_v0, 0.0 }
 0x19f   :  { %v557_v53 = vsub.f32 %v555_v46, %v556_v49  ;;  %v502_v54 = vmul.f32 2.5, %v501_v15  ;;  %v505_v55 = vsub.f32 %v503_v48, %v504_v50  ;;  %v523_v58 = vmul.f32 %v902_v31, %v1298_v20  ;;  %v991_v31 = vld [vmem:[#allocation2 + $0x70] sm:$0xff]   ;;  %v993_v48 = vld [vmem:[#allocation2 + $0x78] sm:$0xff]  }
 0x1a0   :  { %v554_v56 = vmul.f32 1.25, %v553_v1  ;;  %v535_v57 = vmul.f32 %v1321_v2, %v1368_v52  ;;  %vm482_vm7 = vcmp.lt.f32.partialorder %v1371_v7, 0.0  ;;  %v507_v11 = vmul.f32 %v898_v43, %v1331_v28  ;;  %936 = vmatprep.subr.bf16.mxu1 %v991_v31  ;;  %v994_v49 = vld [vmem:[#allocation2 + $0x38] sm:$0xff]  }
 0x1a1   :  { %v558_v59 = vmul.f32 1.25, %v557_v53  ;;  %v506_v60 = vmul.f32 2.5, %v505_v55  ;;  %v536_v61 = vmul.f32 %v1331_v28, %v502_v54  ;;  %v539_v62 = vmul.f32 %v1324_v26, %v502_v54  ;;  %vm483_vm8 = vmand %vm481_vm3, %vm482_vm7  ;;  %937 = vmatpush3.bf16.msra.mxu1 %v992_v8 }
 0x1a2   :  { %v587_v63 = vmul.f32 %v1292_v19, %v554_v56  ;;  %v903_v9 = vsel %vm483_vm8, 1.0, %v1057_v10  ;;  %v508_v14 = vmul.f32 %v1318_v25, %v1295_v38  ;;  %v559_v3 = vmul.f32 %v1301_v22, %v522_v42  ;;  %938 = vmatprep.subr.bf16.mxu1 %v993_v48 }
 0x1a3   :  { %v588_v18 = vmul.f32 %v1304_v0, %v558_v59  ;;  %v537_v21 = vsub.f32 %v535_v57, %v536_v61  ;;  %v540_v24 = vmul.f32 %v1292_v19, %v506_v60  ;;  %v524_v27 = vmul.f32 %v903_v9, %v1371_v7 }
 0x1a4   :  { %v527_v5 = vmul.f32 %v903_v9, %v1304_v0  ;;  %v509_v29 = vsub.f32 %v507_v11, %v508_v14  ;;  %v543_v30 = vmul.f32 %v1307_v23, %v506_v60  ;;  %v1392_v16 = vadd.f32 -2.2, %v1289_v17 }
 0x1a5   :  { %v589_v32 = vsub.f32 %v587_v63, %v588_v18  ;;  %v538_v4 = vmul.f32 1.25, %v537_v21  ;;  %v541_v33 = vsub.f32 %v539_v62, %v540_v24  ;;  %v525_v25 = vsub.f32 %v523_v58, %v524_v27  ;;  %939 = vmatpush3.bf16.msra.mxu1 %v994_v49 }
 0x1a6   :  { %v510_v34 = vmul.f32 2.5, %v509_v29  ;;  %vm486_vm9 = vcmp.ge.f32.partialorder %v1371_v7, 0.0  ;;  %v548_v36 = vmul.f32 %v1301_v22, %v514_v35  ;;  %vm487_vm10 = vcmp.lt.f32.partialorder %v1392_v16, 0.0  ;;  %949 = vmatprep.subr.bf16.mxu1 %v1057_v10 }
 0x1a7   :  { %v590_v0 = vmul.f32 0.8333333, %v589_v32  ;;  %v542_v13 = vmul.f32 1.25, %v541_v33  ;;  %v571_v37 = vmul.f32 %v1321_v2, %v538_v4  ;;  %v526_v39 = vmul.f32 2.5, %v525_v25  ;;  %vm488_vm11 = vmand %vm486_vm9, %vm487_vm10 }
 0x1a8   :  { %v544_v12 = vmul.f32 %v1295_v38, %v510_v34  ;;  %v547_v6 = vmul.f32 %v1331_v28, %v510_v34  ;;  %v1401_v40 = vmul.f32 %v1298_v20, %v554_v56  ;;  %v591_v43 = vmul.f32 %v1295_v38, %v558_v59 }
 0x1a9   :  { %v604_v42 = vpack.c.bf16 %v590_v0, %v590_v0  ;;  %v572_v41 = vmul.f32 %v1292_v19, %v542_v13  ;;  %v560_v35 = vmul.f32 %v1371_v7, %v526_v39  ;;  %v575_v45 = vmul.f32 %v1324_v26, %v542_v13 }
 0x1aa   :  { %v545_v44 = vsub.f32 %v543_v30, %v544_v12  ;;  %v904_v46 = vsel %vm488_vm11, 1.0, %v1057_v10  ;;  %v549_v47 = vsub.f32 %v547_v6, %v548_v36  ;;  %v882_v1 = vadd.f32 2.2, %v1289_v17 }
 0x1ab   :  { %618 = vrot.lane.b32.xlu1 %v604_v42, %s1060_s17  ;;  %v573_v15 = vsub.f32 %v571_v37, %v572_v41  ;;  %v561_v50 = vsub.f32 %v559_v3, %v560_v35  ;;  %v528_v19 = vmul.f32 %v904_v46, %v1392_v16  ;;  %vm437_vm12 = vcmp.lt.f32.partialorder %v1321_v2, 0.0 }
 0x1ac   :  { %v546_v53 = vmul.f32 1.25, %v545_v44  ;;  %v550_v54 = vmul.f32 1.25, %v549_v47  ;;  %v532_v26 = vmul.f32 %v1307_v23, %v1368_v52  ;;  %vm436_vm13 = vcmp.ge.f32.partialorder %v882_v1, 0.0 }
 0x1ad   :  { %v574_v55 = vmul.f32 0.8333333, %v573_v15  ;;  %v562_v56 = vmul.f32 1.25, %v561_v50  ;;  %v529_v57 = vsub.f32 %v527_v5, %v528_v19  ;;  %vm438_vm14 = vmand %vm436_vm13, %vm437_vm12  ;;  %v563_v63 = vmul.f32 %v1298_v20, %v526_v39 }
 0x1ae   :  { %v576_v58 = vmul.f32 %v1295_v38, %v546_v53  ;;  %v579_v59 = vmul.f32 %v1307_v23, %v546_v53  ;;  %v580_v60 = vmul.f32 %v1301_v22, %v550_v54  ;;  %v583_v61 = vmul.f32 %v1331_v28, %v550_v54 }
 0x1af   :  { %v600_v2 = vpack.c.bf16 %v574_v55, %v574_v55  ;;  %v592_v52 = vmul.f32 %v1371_v7, %v562_v56  ;;  %v530_v62 = vmul.f32 2.5, %v529_v57  ;;  %v894_v38 = vsel %vm438_vm14, 1.0, %v1057_v10 }
 0x1b0   :  { %v577_v9 = vsub.f32 %v575_v45, %v576_v58  ;;  %v581_v11 = vsub.f32 %v579_v59, %v580_v60  ;;  %v585_v14 = vsub.f32 %v583_v61, %v1401_v40  ;;  %v491_v21 = vmul.f32 %v894_v38, %v882_v1 }
 0x1b1   :  { %609 = vrot.lane.b32.xlu0 %v600_v2, %s1060_s17  ;;  %v593_v23 = vsub.f32 %v591_v43, %v592_v52  ;;  %v564_v18 = vmul.f32 %v1392_v16, %v530_v62  ;;  %v568_v24 = vmul.f32 %v1331_v28, %v538_v4  ;;  %v595_v8 = vmul.f32 %v1301_v22, %v562_v56 }
 0x1b2   :  { %v578_v27 = vmul.f32 0.8333333, %v577_v9  ;;  %v493_v3 = vsub.f32 %v491_v21, %v1366_v51  ;;  %v582_v29 = vmul.f32 0.8333333, %v581_v11  ;;  %v417_v37 = vsub.f32 0.0, %v1289_v17 }
 0x1b3   :  { %v594_v5 = vmul.f32 0.8333333, %v593_v23  ;;  %v565_v7 = vsub.f32 %v563_v63, %v564_v18  ;;  %v586_v35 = vmul.f32 0.8333333, %v585_v14  ;;  %vm1064_vm15 = vmmov 0  }
 0x1b4   :  { %v601_v20 = vpack.c.bf16 %v578_v27, %v578_v27  ;;  %v494_v32 = vmul.f32 2.5, %v493_v3  ;;  %v602_v28 = vpack.c.bf16 %v582_v29, %v582_v29  ;;  %v418_v39 = vmul.f32 1.442695, %v417_v37 }
 0x1b5   :  { %v605_v30 = vpack.c.bf16 %v594_v5, %v594_v5  ;;  %v566_v31 = vmul.f32 1.25, %v565_v7  ;;  %v603_v45 = vpack.c.bf16 %v586_v35, %v586_v35 }
 0x1b6   :  { %612 = vrot.lane.b32.xlu0 %v601_v20, %s1054_s22  ;;  %v531_v25 = vmul.f32 %v882_v1, %v494_v32  ;;  %1001 = vpow2.f32 %v418_v39 }
 0x1b7   :  { %621 = vrot.lane.b32.xlu1 %v605_v30, %s1054_s22  ;;  %v596_v33 = vmul.f32 %v1392_v16, %v566_v31  ;;  %s1065_s22 = smov [#allocation5]  }
 0x1b8   :  { %v533_v34 = vsub.f32 %v531_v25, %v532_v26  ;;  %v996_v26 = vld [vmem:[#allocation2 + $0x88] sm:$0xff]   ;;  %s840_s23 = sshll.u32 %s1065_s22, 4  ;;  %s841_s23 = int_to_ptr.vmem [resolvable:$true] %s840_s23 }
 0x1b9   :  { %v597_v4 = vsub.f32 %v595_v8, %v596_v33  ;;  %s1027_s24 = scalar_lea.vmem %s841_s23, 128  ;;  %p1032_p9 = scmp.lt.s32.totalorder %s841_s23, %s841_s23 }
 0x1ba   :  { %615 = vrot.lane.b32.xlu0 %v602_v28, %s1062_s20  ;;  %v534_v36 = vmul.f32 1.25, %v533_v34  ;;  %p1028_p8 = scmp.ne.s32.totalorder %s841_s23, %s1027_s24  ;;  %p1033_p10 = scmp.lt.s32.totalorder %s1027_s24, %s1027_s24 }
 0x1bb   :  { %v598_v51 = vmul.f32 0.8333333, %v597_v4 }
 0x1bc   :  { %v567_v13 = vmul.f32 %v882_v1, %v534_v36  ;;  %v995_v1 = vld [vmem:[#allocation2 + $0x80] sm:$0xff]   ;;  %p1034_p11 = por %p1033_p10, %p1032_p9 }
 0x1bd   :  { %v606_v0 = vpack.c.bf16 %v598_v51, %v598_v51 }
 0x1be   :  { %v569_v22 = vsub.f32 %v567_v13, %v568_v24  ;;  %p1035_p12 = pnand %p1034_p11, %p1028_p8 }
 0x1bf   :  { %624 = vrot.lane.b32.xlu1 %v606_v0, %s1062_s20 }
 0x1c0   :  { %v1002_v12 = vpop.eup %1001  ;;  %v570_v41 = vmul.f32 0.8333333, %v569_v22 }
 0x1c1   :  { %v420_v40 = vadd.f32 1.0, %v1002_v12 }
 0x1c2   :  { %v599_v44 = vpack.c.bf16 %v570_v41, %v570_v41 }
 0x1c3   :  { %1003 = vrcp.f32 %v420_v40 }
 0x1cd   :  { %v1004_v54 = vpop.eup %1003 }
 0x1ce   :  { %v423_v55 = vmul.f32 %v1004_v54, %v1289_v17 }
 0x1d0   :  { %v607_v56 = vpack.c.bf16 %v423_v55, %v423_v55 }
 0x21d   :  { %v619_v16 = vpop.permute.xlu1 %618 }
 0x21e   :  { %v636_v48 = vsel %vm265_vm2, %v603_v45, %v619_v16 }
 0x223   :  { %v610_v6 = vpop.permute.xlu0 %609 }
 0x224   :  { %v628_v47 = vsel %vm265_vm2, %v599_v44, %v610_v6 }
 0x228   :  { %v613_v42 = vpop.permute.xlu0 %612 }
 0x229   :  { %v622_v43 = vpop.permute.xlu1 %621  ;;  %v630_v49 = vsel %vm271_vm4, %v628_v47, %v613_v42 }
 0x22a   :  { %v638_v15 = vsel %vm271_vm4, %v636_v48, %v622_v43 }
 0x22c   :  { %v616_v46 = vpop.permute.xlu0 %615 }
 0x22d   :  { %v632_v19 = vsel %vm277_vm6, %v630_v49, %v616_v46 }
 0x231   :  { %v625_v50 = vpop.permute.xlu1 %624 }
 0x232   :  { %v640_v53 = vsel %vm277_vm6, %v638_v15, %v625_v50 }
 0x233   :  { %785 = vmatprep.mubr.bf16.mxu1 %v640_v53 }
 0x234   :  { %786 = vmatmul.mubr.bf16.vlgmr.msra.gmra.mrb[0].mxu1 %v632_v19 }
 0x235   :  { %950 = vmatpush3.bf16.msra.mxu1 %v995_v1  ;;  %953 = vmatprep.mubr.msk.bf16.mxu1 %vm1064_vm15, %v1057_v10 }
 0x236   :  { %951 = vmatprep.subr.bf16.mxu1 %v1057_v10 }
 0x239   :  { %952 = vmatpush3.bf16.msra.mxu1 %v996_v26 }
 0x23c   :  { %954 = vmatmul.mubr.msk.bf16.vlgmr.msra.gmra.mrb[4].mxu1 %vm265_vm2, %v607_v56 }
 0x307   :  { %v940_v57 = vpop.f32.mrb[0].mxu1 }
 0x308   :  { %v941_v58 = vpop.f32.mrb[1].mxu1 }
 0x309   :  { %v942_v59 = vadd.f32 %v941_v58, %v940_v57  ;;  %v943_v60 = vpop.f32.mrb[2].mxu1 }
 0x30a   :  { %v944_v61 = vpop.f32.mrb[3].mxu1 }
 0x30f   :  { %v827_v2 = vpop.f32.mrb[4].mxu1 }
 0x310   :  { %v828_v52 = vadd.f32 %v942_v59, %v827_v2  ;;  %v955_v62 = vpop.f32.mrb[5].mxu1 }
 0x311   :  { %v830_v63 = vpop.f32.mrb[6].mxu1 }
 0x312   :  { %833 = vst [vmem:[#allocation5] sm:$0xff] %v828_v52  ;;  %v956_v10 = vpop.f32.mrb[7].mxu1 }
 0x313   :  { %1038 = shalt.err (!%p1035_p12)
}
 0x314   :  { %s1039_s27 = scalar_lea.hbm %s1461_s3, 128 }
 0x315   :  { %p1040_p13 = scmp.ne.s32.totalorder %s1461_s3, %s1039_s27  ;;  %p1043_p0 = scmp.lt.u32.totalorder %s1039_s27, %s1461_s3 }
 0x317   :  { %p1045_p1 = pnand %p1043_p0, %p1040_p13 }
 0x319   :  { %1048 = shalt.err (!%p1045_p1)
}
 0x31a   :  { %843 = dma.vmem_to_hbm [thread:$0]  %s841_s23, 128, %s1461_s3, [#allocation4]  }
 0x31b   :  { %1051 = dma.done.wait [#allocation4], 128  }
 0x31c   :  { %1052 = vsyncadd [#allocation4], 4294967168 }
 0x31d   :  { %847 = vsyncpa [#allocation3], 1 }
 0x31e   :  { %848 = vsyncpa [#allocation4], 1 }

</bundles_post_ra>
